<compile_context>
chip_gen: v6e
topology: v6e:2x2x1
jax: 0.10.0
libtpu: 0.0.40
codegen_flags: <defaults>
</compile_context>

<pallas_src>
import math
from functools import partial

import jax
import jax.numpy as jnp
from jax.experimental import pallas as pl
from jax.experimental.pallas import tpu as pltpu


_CFG = None


def _round_up(x, m):
    return ((x + m - 1) // m) * m


def _detect_vmem_bytes():
    try:
        info = pltpu.get_tpu_info()
        for attr in ("vmem_capacity_bytes", "vmem_bytes", "vmem_size_bytes"):
            v = getattr(info, attr, None)
            if v:
                return int(v)
    except Exception:
        pass
    try:
        kind = jax.devices()[0].device_kind.lower()
        if "v5" in kind or "v6" in kind:
            return 128 * 1024 * 1024
    except Exception:
        pass
    return 64 * 1024 * 1024          # conservative: v7x has 64 MiB per TensorCore


def _cfg():
    """Per-generation tiling / VMEM-limit preferences."""
    global _CFG
    if _CFG is None:
        vmem = _detect_vmem_bytes()
        if vmem >= 128 * 1024 * 1024:                # v5e / v6e (128 MiB VMEM)
            _CFG = dict(vmem_limit=100 * 2**20, tm=512, tn=512, tk=1024,
                        tq=512, tkv=1024)
        else:                                        # v7x (64 MiB per TC)
            _CFG = dict(vmem_limit=48 * 2**20, tm=256, tn=256, tk=512,
                        tq=256, tkv=512)
    return _CFG


def _pick_tile(size, pref, align):
    """Pick a tile for one axis, preferring no-padding choices.

    Order of preference: full axis when it already fits the preference
    (full-extent blocks are always legal), then an `align`-multiple exact divisor,
    then (last resort) padding to a multiple of `pref`.  Returns (tile, padded)."""
    if size <= pref:
        return size, size
    t = (pref // align) * align
    while t >= align:
        if size % t == 0:
            if t * 4 >= pref:
                return t, size
            break
        t -= align
    tile = (pref // align) * align
    return tile, _round_up(size, tile)


def _pick_tile_nopad(size, pref, align):
    """Tile that exactly divides `size` (falls back to the full axis).  Never pads."""
    if size <= pref:
        return size
    t = (pref // align) * align
    while t >= align:
        if size % t == 0:
            return t
        t -= align
    return size


# ----------------------------------------------------------------------------
# Tiled matmul kernel (optionally with a fused LayerNorm epilogue).
# ----------------------------------------------------------------------------

def _matmul_kernel(x_ref, w_ref, b_ref, o_ref, acc_ref):
    @pl.when(pl.program_id(2) == 0)
    def _init():
        acc_ref[...] = jnp.zeros_like(acc_ref)

    acc_ref[...] += jnp.dot(x_ref[...], w_ref[...],
                            preferred_element_type=jnp.float32)

    @pl.when(pl.program_id(2) == pl.num_programs(2) - 1)
    def _finish():
        o_ref[...] = (acc_ref[...] + b_ref[...]).astype(o_ref.dtype)


def _matmul_ln_kernel(x_ref, w_ref, b_ref, g_ref, beta_ref, o_ref, acc_ref, *, eps):
    @pl.when(pl.program_id(2) == 0)
    def _init():
        acc_ref[...] = jnp.zeros_like(acc_ref)

    acc_ref[...] += jnp.dot(x_ref[...], w_ref[...],
                            preferred_element_type=jnp.float32)

    @pl.when(pl.program_id(2) == pl.num_programs(2) - 1)
    def _finish():
        y = acc_ref[...] + b_ref[...]
        mean = jnp.mean(y, axis=-1, keepdims=True)
        var = jnp.mean((y - mean) ** 2, axis=-1, keepdims=True)
        yn = (y - mean) * jax.lax.rsqrt(var + eps)
        o_ref[...] = (yn * g_ref[...] + beta_ref[...]).astype(o_ref.dtype)


def pallas_matmul(x, w, b, *, ln=None, eps=1e-5, compute_dtype=None):
    """y = x @ w + b, optionally followed by LayerNorm over the output features.

    x: (M, K), w: (K, D), b: (D,).  K-accumulating tiled kernel with an f32 VMEM
    accumulator.  compute_dtype=jnp.bfloat16 feeds the MXU bf16 inputs; the f32
    accumulator and f32 output are unchanged.
    """
    M, K = x.shape
    K2, D = w.shape
    assert K == K2
    cfg = _cfg()
    out_dtype = x.dtype
    in_bytes = jnp.dtype(compute_dtype or x.dtype).itemsize
    out_bytes = jnp.dtype(out_dtype).itemsize

    tk = _pick_tile_nopad(K, cfg["tk"], 128)
    if ln is None and D > cfg["tn"]:
        tn = _pick_tile_nopad(D, cfg["tn"], 128)
    else:
        tn = D                                  # LN epilogue needs the full feature row

    # VMEM guard (matters on v7x and whenever the LN epilogue forces tn == D):
    # double-buffered inputs + double-buffered output + f32 accumulator.
    budget = int(cfg["vmem_limit"] * 0.7)
    denom = 2 * tk * in_bytes + 2 * tn * out_bytes + tn * 4
    tm_cap = max(8, (budget - 2 * tk * tn * in_bytes) // max(denom, 1))
    tm_pref = max(8, min(cfg["tm"], (tm_cap // 8) * 8))
    tm, Mp = _pick_tile(M, tm_pref, 8)

    xp = x if Mp == M else jnp.pad(x, ((0, Mp - M), (0, 0)))
    wp = w
    if compute_dtype is not None and xp.dtype != compute_dtype:
        xp = xp.astype(compute_dtype)
        wp = w.astype(compute_dtype)
    b2 = b.reshape(1, D).astype(jnp.float32)

    in_specs = [pl.BlockSpec((tm, tk), lambda i, j, k: (i, k)),
                pl.BlockSpec((tk, tn), lambda i, j, k: (k, j)),
                pl.BlockSpec((1, tn), lambda i, j, k: (0, j))]
    args = [xp, wp, b2]
    if ln is None:
        kernel = _matmul_kernel
    else:
        gamma, beta = ln
        kernel = partial(_matmul_ln_kernel, eps=eps)
        in_specs += [pl.BlockSpec((1, D), lambda i, j, k: (0, 0)),
                     pl.BlockSpec((1, D), lambda i, j, k: (0, 0))]
        args += [gamma.reshape(1, D).astype(jnp.float32),
                 beta.reshape(1, D).astype(jnp.float32)]

    out = pl.pallas_call(
        kernel,
        out_shape=jax.ShapeDtypeStruct((Mp, D), out_dtype),
        grid=(Mp // tm, D // tn, K // tk),
        in_specs=in_specs,
        out_specs=pl.BlockSpec((tm, tn), lambda i, j, k: (i, j)),
        scratch_shapes=[pltpu.VMEM((tm, tn), jnp.float32)],
        compiler_params=pltpu.CompilerParams(
            dimension_semantics=("parallel", "parallel", "arbitrary"),
            vmem_limit_bytes=cfg["vmem_limit"]),
    )(*args)
    return out[:M] if Mp != M else out


# ----------------------------------------------------------------------------
# Fused LayerNorm -> conf head (DownLayer's conf = Linear(norm(x)), D = 1).
# The 1-wide head is a VPU multiply + row reduction, not an MXU matvec.
# ----------------------------------------------------------------------------

def _ln_conf_kernel(x_ref, g_ref, bln_ref, w_ref, bo_ref, o_ref, *, eps):
    x = x_ref[...].astype(jnp.float32)
    mean = jnp.mean(x, axis=-1, keepdims=True)
    var = jnp.mean((x - mean) ** 2, axis=-1, keepdims=True)
    xn = (x - mean) * jax.lax.rsqrt(var + eps)
    y = xn * g_ref[...] + bln_ref[...]
    o_ref[...] = (jnp.sum(y * w_ref[...], axis=-1, keepdims=True)
                  + bo_ref[...]).astype(o_ref.dtype)


def pallas_ln_conf(x2d, gamma, beta, w, b, *, eps=1e-5):
    M, C = x2d.shape
    cfg = _cfg()
    budget = int(cfg["vmem_limit"] * 0.7)
    tm_pref = min(512, max(8, ((budget // max(3 * C * 4, 1)) // 8) * 8))
    tm, Mp = _pick_tile(M, tm_pref, 8)
    xp = x2d if Mp == M else jnp.pad(x2d, ((0, Mp - M), (0, 0)))
    out = pl.pallas_call(
        partial(_ln_conf_kernel, eps=eps),
        out_shape=jax.ShapeDtypeStruct((Mp, 1), x2d.dtype),
        grid=(Mp // tm,),
        in_specs=[pl.BlockSpec((tm, C), lambda i: (i, 0)),
                  pl.BlockSpec((1, C), lambda i: (0, 0)),
                  pl.BlockSpec((1, C), lambda i: (0, 0)),
                  pl.BlockSpec((1, C), lambda i: (0, 0)),
                  pl.BlockSpec((1, 1), lambda i: (0, 0))],
        out_specs=pl.BlockSpec((tm, 1), lambda i: (i, 0)),
        compiler_params=pltpu.CompilerParams(
            dimension_semantics=("parallel",),
            vmem_limit_bytes=cfg["vmem_limit"]),
    )(xp, gamma.reshape(1, C).astype(jnp.float32),
      beta.reshape(1, C).astype(jnp.float32),
      w.reshape(1, C).astype(jnp.float32),
      b.reshape(1, 1).astype(jnp.float32))
    return out[:M] if Mp != M else out


# ----------------------------------------------------------------------------
# Flash-style attention with lane-dense (B, N, h*hd) layout.
# ----------------------------------------------------------------------------

def _flash_attn_kernel(*refs, num_heads, head_dim, use_bias, needs_mask, nkv):
    if use_bias:
        q_ref, k_ref, v_ref, b_ref, o_ref, m_scr, l_scr, acc_scr = refs
    else:
        q_ref, k_ref, v_ref, o_ref, m_scr, l_scr, acc_scr = refs
        b_ref = None

    @pl.when(pl.program_id(2) == 0)
    def _init():
        m_scr[...] = jnp.full(m_scr.shape, -1e30, jnp.float32)
        l_scr[...] = jnp.zeros_like(l_scr)
        acc_scr[...] = jnp.zeros_like(acc_scr)

    q = q_ref[0]                       # (TQ,  h*hd) native dtype (bf16 or f32)
    k = k_ref[0]                       # (TKV, h*hd)
    v = v_ref[0]
    tq, tkv = q.shape[0], k.shape[0]

    # conf bias / padded-key mask built once (f32) and hoisted out of the head loop.
    bias = None
    if use_bias:
        bias = b_ref[0].astype(jnp.float32)                       # (1, TKV)
    if needs_mask:
        key_idx = (pl.program_id(2) * tkv
                   + jax.lax.broadcasted_iota(jnp.int32, (1, tkv), 1))
        pad = jnp.where(key_idx < nkv, 0.0, -1e30).astype(jnp.float32)
        bias = pad if bias is None else bias + pad
    if bias is not None:
        bias = jnp.broadcast_to(bias, (tq, tkv))

    for h in range(num_heads):
        sl = slice(h * head_dim, (h + 1) * head_dim)
        s = jax.lax.dot_general(q[:, sl], k[:, sl], (((1,), (1,)), ((), ())),
                                preferred_element_type=jnp.float32)   # (TQ, TKV) f32
        if bias is not None:
            s = s + bias
        m_prev = m_scr[h]
        m_new = jnp.maximum(m_prev, jnp.max(s, axis=-1, keepdims=True))
        alpha = jnp.exp(m_prev - m_new)
        p = jnp.exp(s - m_new)
        l_scr[h] = alpha * l_scr[h] + jnp.sum(p, axis=-1, keepdims=True)
        pv = jnp.dot(p.astype(v.dtype), v[:, sl],
                     preferred_element_type=jnp.float32)              # (TQ, hd) f32
        acc_scr[:, sl] = alpha * acc_scr[:, sl] + pv                  # lane-dense acc
        m_scr[h] = m_new

    @pl.when(pl.program_id(2) == pl.num_programs(2) - 1)
    def _finish():
        for h in range(num_heads):
            sl = slice(h * head_dim, (h + 1) * head_dim)
            inv_l = pl.reciprocal(l_scr[h], approx=True)              # EUP, (TQ, 1)
            o_ref[0, :, sl] = (acc_scr[:, sl] * inv_l).astype(o_ref.dtype)


def pallas_attention(q, k, v, bias, num_heads, *, compute_dtype=None):
    """softmax(q @ k^T + bias) @ v with heads packed on the last (lane) axis.

    q: (B, Nq, h*hd) -- the 1/sqrt(hd) scale must be pre-folded into q.
    k, v: (B, Nkv, h*hd).  bias: None or (B, Nkv) per-key logit bias (conf).
    """
    B, Nq, Dh = q.shape
    _, Nkv, _ = k.shape
    assert Dh % num_heads == 0
    hd = Dh // num_heads
    cfg = _cfg()

    tq, Nqp = _pick_tile(Nq, cfg["tq"], 8)
    tkv, Nkvp = _pick_tile(Nkv, cfg["tkv"], 8)

    qp = q if Nqp == Nq else jnp.pad(q, ((0, 0), (0, Nqp - Nq), (0, 0)))
    kp = k if Nkvp == Nkv else jnp.pad(k, ((0, 0), (0, Nkvp - Nkv), (0, 0)))
    vp = v if Nkvp == Nkv else jnp.pad(v, ((0, 0), (0, Nkvp - Nkv), (0, 0)))
    if compute_dtype is not None:
        qp, kp, vp = (a.astype(compute_dtype) for a in (qp, kp, vp))

    use_bias = bias is not None
    needs_mask = Nkvp != Nkv                 # padded keys masked in-kernel via iota

    # Q-tile axis leads (parallel work for both v7x TensorCores even at small B),
    # batch second, KV reduction last.
    grid = (Nqp // tq, B, Nkvp // tkv)
    in_specs = [pl.BlockSpec((1, tq, Dh), lambda qi, b, ki: (b, qi, 0)),
                pl.BlockSpec((1, tkv, Dh), lambda qi, b, ki: (b, ki, 0)),
                pl.BlockSpec((1, tkv, Dh), lambda qi, b, ki: (b, ki, 0))]
    args = [qp, kp, vp]
    if use_bias:
        bfull = bias.reshape(B, 1, Nkv).astype(jnp.float32)
        if needs_mask:
            bfull = jnp.pad(bfull, ((0, 0), (0, 0), (0, Nkvp - Nkv)))
        args.append(bfull)
        in_specs.append(pl.BlockSpec((1, 1, tkv), lambda qi, b, ki: (b, 0, ki)))

    out = pl.pallas_call(
        partial(_flash_attn_kernel, num_heads=num_heads, head_dim=hd,
                use_bias=use_bias, needs_mask=needs_mask, nkv=Nkv),
        out_shape=jax.ShapeDtypeStruct((B, Nqp, Dh), q.dtype),
        grid=grid,
        in_specs=in_specs,
        out_specs=pl.BlockSpec((1, tq, Dh), lambda qi, b, ki: (b, qi, 0)),
        scratch_shapes=[pltpu.VMEM((num_heads, tq, 1), jnp.float32),
                        pltpu.VMEM((num_heads, tq, 1), jnp.float32),
                        pltpu.VMEM((tq, Dh), jnp.float32)],
        compiler_params=pltpu.CompilerParams(
            dimension_semantics=("parallel", "parallel", "arbitrary"),
            vmem_limit_bytes=cfg["vmem_limit"]),
    )(*args)
    return out[:, :Nq] if Nqp != Nq else out


# ----------------------------------------------------------------------------
# 3x3 stride-1 'same' conv, NHWC in / NHWC out.
# ----------------------------------------------------------------------------

def _conv3x3_nhwc_kernel(x_ref, w_ref, b_ref, o_ref, *, H, W):
    # x_ref: (1, H+2, W+2, C) padded map for this batch; w_ref: (9, C, O).
    acc = None
    for t in range(9):
        dy, dx = t // 3, t % 3
        win = x_ref[0, dy:dy + H, dx:dx + W, :]          # (H, W, C)
        win2 = win.reshape(H * W, win.shape[-1])
        part = jnp.dot(win2, w_ref[t], preferred_element_type=jnp.float32)
        acc = part if acc is None else acc + part
    o_ref[0] = (acc + b_ref[...]).astype(o_ref.dtype)


def pallas_conv3x3_nhwc(x_map, w_oihw, b, *, compute_dtype=None):
    """3x3 'same' conv accumulating the nine taps in-kernel (no 9x im2col buffer,
    no NCHW transposes).  Falls back to an NHWC im2col + tiled matmul when the
    per-batch map does not fit VMEM or the width is not sublane-aligned.
    TODO(synk): very large maps would need a row-tiled halo variant."""
    B, H, W, C = x_map.shape
    O = w_oihw.shape[0]
    cfg = _cfg()
    ib = jnp.dtype(compute_dtype or x_map.dtype).itemsize
    need = (2 * (H + 2) * (W + 2) * C * ib + 2 * 9 * C * O * ib
            + 2 * H * W * O * jnp.dtype(x_map.dtype).itemsize
            + 2 * H * W * max(C, O) * 4)
    fits = need < int(cfg["vmem_limit"] * 0.6)

    xp = jnp.pad(x_map, ((0, 0), (1, 1), (1, 1), (0, 0)))
    w_taps = jnp.transpose(w_oihw, (2, 3, 1, 0)).reshape(9, C, O)   # (dy,dx) -> (C,O)
    b2 = b.reshape(1, O).astype(jnp.float32)

    if fits and W % 8 == 0:
        xf, wf = xp, w_taps
        if compute_dtype is not None:
            xf = xf.astype(compute_dtype)
            wf = wf.astype(compute_dtype)
        try:
            out = pl.pallas_call(
                partial(_conv3x3_nhwc_kernel, H=H, W=W),
                out_shape=jax.ShapeDtypeStruct((B, H * W, O), x_map.dtype),
                grid=(B,),
                in_specs=[pl.BlockSpec((1, H + 2, W + 2, C), lambda bi: (bi, 0, 0, 0)),
                          pl.BlockSpec((9, C, O), lambda bi: (0, 0, 0)),
                          pl.BlockSpec((1, O), lambda bi: (0, 0))],
                out_specs=pl.BlockSpec((1, H * W, O), lambda bi: (bi, 0, 0)),
                compiler_params=pltpu.CompilerParams(
                    dimension_semantics=("parallel",),
                    vmem_limit_bytes=cfg["vmem_limit"]),
            )(xf, wf, b2)
            return out.reshape(B, H, W, O)
        except Exception:
            pass    # fall through to the im2col path

    # Fallback: NHWC im2col + the tiled matmul (still no NCHW transposes).
    cols = [xp[:, dy:dy + H, dx:dx + W, :] for dy in range(3) for dx in range(3)]
    patches = jnp.stack(cols, axis=3).reshape(B * H * W, 9 * C)
    w2d = w_taps.reshape(9 * C, O)
    y = pallas_matmul(patches, w2d, b, compute_dtype=compute_dtype)
    return y.reshape(B, H, W, O)


# ----------------------------------------------------------------------------
# Plain-JAX glue (NHWC end-to-end).
# TODO(synk): token2map's index_add scatter, the depthwise Gaussian filter,
# grid_sample (map2token / get_pos_embed) and gumbel top-k / gather are
# data-dependent gather/scatter glue with no clean Pallas TPU mapping.
# ----------------------------------------------------------------------------

def gaussian_filt_nhwc(x, kernel_size=3, sigma=2.0):
    channels = x.shape[-1]
    coords = jnp.arange(kernel_size, dtype=jnp.float32)
    xg, yg = jnp.meshgrid(coords, coords)
    mean = (kernel_size - 1) / 2.0
    variance = float(sigma) ** 2.0
    g = (1.0 / (2.0 * math.pi * variance)) * jnp.exp(
        -((xg - mean) ** 2 + (yg - mean) ** 2) / (2.0 * variance))
    g = g / jnp.sum(g)
    w = jnp.broadcast_to(g[:, :, None, None], (kernel_size, kernel_size, 1, channels))
    pad = int((kernel_size - 1) // 2)
    return jax.lax.conv_general_dilated(
        x, w, window_strides=(1, 1), padding=[(pad, pad), (pad, pad)],
        dimension_numbers=("NHWC", "HWIO", "NHWC"),
        feature_group_count=channels)


def reconstruct_feature_nhwc(feature, mask, kernel_size, sigma):
    if kernel_size <= 1:
        return feature
    feature = feature * mask
    out = gaussian_filt_nhwc(jnp.concatenate([feature, mask], axis=-1),
                             kernel_size=kernel_size, sigma=sigma)
    feature_inter = out[..., :-1]
    mask_inter = out[..., -1:]
    feature_inter = feature_inter / (mask_inter + 1e-6)
    mask_inter = (mask_inter > 0).astype(feature.dtype)
    feature_inter = feature_inter * mask_inter
    return feature + (1 - mask) * feature_inter


def token2map_nhwc(x, loc, map_size, kernel_size, sigma):
    """token2map from my_pvt10, emitting NHWC (keeps the map pipeline lane-dense)."""
    H, W = map_size
    B, N, C = x.shape
    loc = jnp.clip(loc, 0.0, 1.0)
    loc = loc * jnp.array([W - 1, H - 1], dtype=loc.dtype)[None, None, :]
    loc = jnp.round(loc).astype(jnp.int32)
    idx = loc[..., 0] + loc[..., 1] * W
    idx = idx + jnp.arange(B, dtype=jnp.int32)[:, None] * (H * W)
    src = jnp.concatenate([x, jnp.ones((B, N, 1), x.dtype)], axis=-1).reshape(B * N, C + 1)
    out = jnp.zeros((B * H * W, C + 1), x.dtype)
    out = out.at[idx.reshape(B * N)].add(src)
    out = out.reshape(B, H, W, C + 1)
    feature, mask = out[..., :-1], out[..., -1:]
    feature = feature / (mask + 1e-6)
    mask = (mask > 0).astype(x.dtype)
    feature = feature * mask
    return reconstruct_feature_nhwc(feature, mask, kernel_size, sigma)


def grid_sample_points_nhwc(feat, loc01):
    """Bilinear F.grid_sample (align_corners=False, zero padding) at points in [0,1]."""
    B, H, W, C = feat.shape
    Npts = loc01.shape[1]
    gx = loc01[..., 0] * 2.0 - 1.0
    gy = loc01[..., 1] * 2.0 - 1.0
    ix = ((gx + 1.0) * W - 1.0) / 2.0
    iy = ((gy + 1.0) * H - 1.0) / 2.0
    ix0 = jnp.floor(ix)
    iy0 = jnp.floor(iy)
    flat = feat.reshape(B, H * W, C)

    def corner(iy_, ix_):
        valid = (ix_ >= 0) & (ix_ <= W - 1) & (iy_ >= 0) & (iy_ <= H - 1)
        ixc = jnp.clip(ix_, 0, W - 1).astype(jnp.int32)
        iyc = jnp.clip(iy_, 0, H - 1).astype(jnp.int32)
        idx = jnp.broadcast_to((iyc * W + ixc)[..., None], (B, Npts, C))
        g = jnp.take_along_axis(flat, idx, axis=1)
        return jnp.where(valid[..., None], g, 0.0)

    wx1 = ix - ix0
    wx0 = 1.0 - wx1
    wy1 = iy - iy0
    wy0 = 1.0 - wy1
    return (corner(iy0, ix0) * (wy0 * wx0)[..., None]
            + corner(iy0, ix0 + 1) * (wy0 * wx1)[..., None]
            + corner(iy0 + 1, ix0) * (wy1 * wx0)[..., None]
            + corner(iy0 + 1, ix0 + 1) * (wy1 * wx1)[..., None])


def map2token_nhwc(feature_map, loc_xy):
    return grid_sample_points_nhwc(feature_map, loc_xy)


def get_pos_embed_nhwc(pos_embed, loc_xy, pos_size):
    H, W = pos_size
    B = loc_xy.shape[0]
    C = pos_embed.shape[-1]
    pe = jnp.broadcast_to(pos_embed.reshape(1, H, W, C), (B, H, W, C))
    return grid_sample_points_nhwc(pe, loc_xy)


def gumble_top_k(key, x, k, p_value=1e-6):
    noise = jax.random.uniform(key, x.shape, x.dtype)
    noise = -jnp.log(noise + p_value)
    noise = -jnp.log(noise + p_value)
    scores = (x + noise)[..., 0]
    _, idx = jax.lax.top_k(scores, k)
    return idx                                                # (B, k)


# ----------------------------------------------------------------------------
# Modules.
# ----------------------------------------------------------------------------

class MyAttentionPallas:
    """MyAttention (my_pvt10) forward in Pallas; used as DownLayer's down_block."""

    def __init__(self, key, dim, dim_out=-1, num_heads=8, qkv_bias=False,
                 qk_scale=None, sr_ratio=1, compute_dtype=jnp.bfloat16):
        if dim_out < 0:
            dim_out = dim
        assert dim_out % num_heads == 0
        self.dim, self.dim_out, self.num_heads = dim, dim_out, num_heads
        head_dim = dim // num_heads
        self.scale = qk_scale if qk_scale is not None else head_dim ** (-0.5)
        self.sr_ratio = sr_ratio
        self.attn = self                     # DownLayer reads block.attn.sr_ratio
        self.compute_dtype = compute_dtype

        keys = jax.random.split(key, 8)
        init = lambda k, s: (0.02 * jax.random.normal(k, s)).astype(jnp.float32)
        self.wq = init(keys[0], (dim, dim_out))
        self.wk = init(keys[1], (dim, dim_out))
        self.wv = init(keys[2], (dim, dim_out))
        zeros_out = jnp.zeros((dim_out,), jnp.float32)
        self.bq = init(keys[3], (dim_out,)) if qkv_bias else zeros_out
        self.bk = init(keys[4], (dim_out,)) if qkv_bias else zeros_out
        self.bv = init(keys[5], (dim_out,)) if qkv_bias else zeros_out
        self.wp = init(keys[6], (dim_out, dim_out))
        self.bp = jnp.zeros((dim_out,), jnp.float32)
        # Pre-scaled / fused views used on the Pallas path.
        self.wq_s, self.bq_s = self.wq * self.scale, self.bq * self.scale
        self.wkv = jnp.concatenate([self.wk, self.wv], axis=1)
        self.bkv = jnp.concatenate([self.bk, self.bv], axis=0)
        if sr_ratio > 1:
            self.w_sr = init(keys[7], (dim, dim, sr_ratio, sr_ratio))   # OIHW
            self.b_sr = jnp.zeros((dim,), jnp.float32)
            self.ln_g = jnp.ones((dim,), jnp.float32)
            self.ln_b = jnp.zeros((dim,), jnp.float32)

    def __call__(self, x, x_source, loc_source, H, W, conf_source=None):
        B, N, C = x.shape
        Dh = self.dim_out
        cdt = self.compute_dtype
        # q projection; 1/sqrt(head_dim) folded into the weights.
        q = pallas_matmul(x.reshape(B * N, C), self.wq_s, self.bq_s,
                          compute_dtype=cdt).reshape(B, N, Dh)

        if self.sr_ratio > 1:
            sr = self.sr_ratio
            x_map = token2map_nhwc(x_source, loc_source, (H, W), sr - 1, 2)  # (B,H,W,C)
            Ho, Wo = H // sr, W // sr
            # stride==kernel sr-conv == non-overlapping patch matmul, LayerNorm fused.
            patches = x_map.reshape(B, Ho, sr, Wo, sr, C)
            patches = patches.transpose(0, 1, 3, 2, 4, 5).reshape(B * Ho * Wo, sr * sr * C)
            w_sr2d = jnp.transpose(self.w_sr, (2, 3, 1, 0)).reshape(sr * sr * C, C)
            x_src2d = pallas_matmul(patches, w_sr2d, self.b_sr,
                                    ln=(self.ln_g, self.ln_b), compute_dtype=cdt)
            x_source = x_src2d.reshape(B, Ho * Wo, C)
            if conf_source is not None:
                # TODO(synk): my_pvt10's exact conf down-sampling for sr_ratio>1 is not
                # in the provided spec; we use token2map + sr x sr mean pooling.
                conf_map = token2map_nhwc(conf_source, loc_source, (H, W), sr - 1, 2)
                conf_source = jnp.mean(conf_map.reshape(B, Ho, sr, Wo, sr, 1),
                                       axis=(2, 4)).reshape(B, Ho * Wo, 1)

        Ns = x_source.shape[1]
        # Fused k/v projection: one read of x_source, one matmul.
        kv = pallas_matmul(x_source.reshape(B * Ns, C), self.wkv, self.bkv,
                           compute_dtype=cdt)
        kv = kv.reshape(B, Ns, 2 * Dh)
        k, v = kv[..., :Dh], kv[..., Dh:]

        bias = None if conf_source is None else conf_source.reshape(B, Ns)
        out = pallas_attention(q, k, v, bias, self.num_heads, compute_dtype=cdt)
        out = pallas_matmul(out.reshape(B * N, Dh), self.wp, self.bp,
                            compute_dtype=cdt).reshape(B, N, Dh)
        return out


class DownLayerPallas:
    """DownLayer (my_pvt10) forward; pos_drop is the identity (inference / p=0)."""

    def __init__(self, key, sample_num, embed_dim, drop_rate, down_block,
                 compute_dtype=jnp.bfloat16):
        self.sample_num = sample_num
        self.block = down_block
        self.drop_rate = drop_rate
        self.compute_dtype = compute_dtype
        C = embed_dim
        k1, k2, k3, k4 = jax.random.split(key, 4)
        init = lambda k, s: (0.02 * jax.random.normal(k, s)).astype(jnp.float32)
        self.norm_g = jnp.ones((C,), jnp.float32)
        self.norm_b = jnp.zeros((C,), jnp.float32)
        self.conf_w = init(k1, (C, 1))
        self.conf_b = init(k2, (1,))
        self.conv_w = init(k3, (C, C, 3, 3))     # OIHW
        self.conv_b = init(k4, (C,))

    def __call__(self, x, pos, pos_embed, H, W, pos_size, N_grid, key):
        B, N, C = x.shape
        assert self.sample_num <= N
        x_map = token2map_nhwc(x, pos, (H, W), self.block.attn.sr_ratio - 1, 2)
        x_map = pallas_conv3x3_nhwc(x_map, self.conv_w, self.conv_b,
                                    compute_dtype=self.compute_dtype)
        x_tok = map2token_nhwc(x_map, pos)
        # conf = Linear(LayerNorm(x)) as a single fused LN + VPU-reduce kernel (f32).
        conf = pallas_ln_conf(x_tok.reshape(B * N, C), self.norm_g, self.norm_b,
                              self.conf_w, self.conf_b).reshape(B, N, 1)
        x_grid, x_ada = x_tok[:, :N_grid], x_tok[:, N_grid:]
        pos_grid, pos_ada = pos[:, :N_grid], pos[:, N_grid:]
        conf_ada = conf[:, N_grid:]
        idx = gumble_top_k(key, conf_ada, self.sample_num)
        x_down = jnp.take_along_axis(
            x_ada, jnp.broadcast_to(idx[:, :, None], (B, self.sample_num, C)), axis=1)
        pos_down = jnp.take_along_axis(
            pos_ada, jnp.broadcast_to(idx[:, :, None], (B, self.sample_num, 2)), axis=1)
        x_down = jnp.concatenate([x_grid, x_down], axis=1)
        pos_down = jnp.concatenate([pos_grid, pos_down], axis=1)
        x_down = self.block(x_down, x_tok, pos, H, W, conf_source=conf)
        x_down = x_down + get_pos_embed_nhwc(pos_embed, pos_down, pos_size)
        # TODO(synk): self.pos_drop (Dropout) is the identity at inference / p=0.
        return x_down, pos_down


# ----------------------------------------------------------------------------
# Pure-JAX reference.
# ----------------------------------------------------------------------------

def _ref_layernorm(x, g, b, eps=1e-5):
    mean = jnp.mean(x, axis=-1, keepdims=True)
    var = jnp.mean((x - mean) ** 2, axis=-1, keepdims=True)
    return (x - mean) / jnp.sqrt(var + eps) * g + b


def ref_attention(mod, x, x_source, loc_source, H, W, conf_source=None):
    B, N, C = x.shape
    h, hd = mod.num_heads, mod.dim_out // mod.num_heads
    q = (x @ mod.wq + mod.bq).reshape(B, N, h, hd).transpose(0, 2, 1, 3)
    if mod.sr_ratio > 1:
        sr = mod.sr_ratio
        x_map = token2map_nhwc(x_source, loc_source, (H, W), sr - 1, 2)
        w_hwio = jnp.transpose(mod.w_sr, (2, 3, 1, 0))
        y = jax.lax.conv_general_dilated(
            x_map, w_hwio, (sr, sr), "VALID",
            dimension_numbers=("NHWC", "HWIO", "NHWC")) + mod.b_sr[None, None, None, :]
        Ho, Wo = H // sr, W // sr
        x_source = _ref_layernorm(y.reshape(B, Ho * Wo, C), mod.ln_g, mod.ln_b)
        if conf_source is not None:
            conf_map = token2map_nhwc(conf_source, loc_source, (H, W), sr - 1, 2)
            conf_source = jnp.mean(conf_map.reshape(B, Ho, sr, Wo, sr, 1),
                                   axis=(2, 4)).reshape(B, Ho * Wo, 1)
    Ns = x_source.shape[1]
    k = (x_source @ mod.wk + mod.bk).reshape(B, Ns, h, hd).transpose(0, 2, 1, 3)
    v = (x_source @ mod.wv + mod.bv).reshape(B, Ns, h, hd).transpose(0, 2, 1, 3)
    attn = jnp.einsum("bhnd,bhmd->bhnm", q, k) * mod.scale
    if conf_source is not None:
        attn = attn + conf_source.squeeze(-1)[:, None, None, :]
    attn = jax.nn.softmax(attn, axis=-1)
    out = jnp.einsum("bhnm,bhmd->bhnd", attn, v).transpose(0, 2, 1, 3)
    return out.reshape(B, N, mod.dim_out) @ mod.wp + mod.bp


def ref_downlayer(dl, x, pos, pos_embed, H, W, pos_size, N_grid, key):
    B, N, C = x.shape
    x_map = token2map_nhwc(x, pos, (H, W), dl.block.attn.sr_ratio - 1, 2)
    w_hwio = jnp.transpose(dl.conv_w, (2, 3, 1, 0))
    x_map = jax.lax.conv_general_dilated(
        x_map, w_hwio, (1, 1), [(1, 1), (1, 1)],
        dimension_numbers=("NHWC", "HWIO", "NHWC")) + dl.conv_b[None, None, None, :]
    x_tok = map2token_nhwc(x_map, pos)
    conf = _ref_layernorm(x_tok, dl.norm_g, dl.norm_b) @ dl.conf_w + dl.conf_b
    x_grid, x_ada = x_tok[:, :N_grid], x_tok[:, N_grid:]
    pos_grid, pos_ada = pos[:, :N_grid], pos[:, N_grid:]
    conf_ada = conf[:, N_grid:]
    idx = gumble_top_k(key, conf_ada, dl.sample_num)
    x_down = jnp.take_along_axis(
        x_ada, jnp.broadcast_to(idx[:, :, None], (B, dl.sample_num, C)), axis=1)
    pos_down = jnp.take_along_axis(
        pos_ada, jnp.broadcast_to(idx[:, :, None], (B, dl.sample_num, 2)), axis=1)
    x_down = jnp.concatenate([x_grid, x_down], axis=1)
    pos_down = jnp.concatenate([pos_grid, pos_down], axis=1)
    x_down = ref_attention(dl.block, x_down, x_tok, pos, H, W, conf_source=conf)
    x_down = x_down + get_pos_embed_nhwc(pos_embed, pos_down, pos_size)
    return x_down, pos_down


# ----------------------------------------------------------------------------
# Self-test.
# ----------------------------------------------------------------------------

if __name__ == "__main__":
    root = jax.random.PRNGKey(0)
    kx, kpos, kpe, kb1, kb2, kd1, kd2, kg1, kg2 = jax.random.split(root, 9)

    B, N, C = 2, 24, 32
    num_heads = 4
    H = W = 8
    pos_size = (8, 8)
    N_grid, sample_num = 8, 8

    x = jax.random.normal(kx, (B, N, C), jnp.float32)
    pos = jax.random.uniform(kpos, (B, N, 2), jnp.float32)
    pos_embed = 0.02 * jax.random.normal(kpe, (1, pos_size[0] * pos_size[1], C),
                                         jnp.float32)

    # --- correctness: f32 compute vs. pure-JAX reference -----------------------
    block1 = MyAttentionPallas(kb1, dim=C, num_heads=num_heads, qkv_bias=True,
                               sr_ratio=1, compute_dtype=None)
    layer1 = DownLayerPallas(kd1, sample_num, C, 0.0, block1, compute_dtype=None)
    out1, pd1 = layer1(x, pos, pos_embed, H, W, pos_size, N_grid, kg1)
    ref1, rpd1 = ref_downlayer(layer1, x, pos, pos_embed, H, W, pos_size, N_grid, kg1)

    block2 = MyAttentionPallas(kb2, dim=C, num_heads=num_heads, qkv_bias=True,
                               sr_ratio=4, compute_dtype=None)
    layer2 = DownLayerPallas(kd2, sample_num, C, 0.0, block2, compute_dtype=None)
    out2, pd2 = layer2(x, pos, pos_embed, H, W, pos_size, N_grid, kg2)
    ref2, rpd2 = ref_downlayer(layer2, x, pos, pos_embed, H, W, pos_size, N_grid, kg2)

    jax.block_until_ready((out1, out2, pd1, pd2))

    Nd = N_grid + sample_num
    assert out1.shape == (B, Nd, C) and pd1.shape == (B, Nd, 2)
    assert out2.shape == (B, Nd, C) and pd2.shape == (B, Nd, 2)
    d1 = float(jnp.max(jnp.abs(out1 - ref1)))
    d2 = float(jnp.max(jnp.abs(out2 - ref2)))
    p1 = float(jnp.max(jnp.abs(pd1 - rpd1)))
    p2 = float(jnp.max(jnp.abs(pd2 - rpd2)))
    assert d1 < 1e-2 and d2 < 1e-2 and p1 < 1e-5 and p2 < 1e-5, (d1, d2, p1, p2)

    # --- performance path: bf16 MXU inputs (f32 accumulators / f32 outputs) ----
    for mod in (layer1, block1, layer2, block2):
        mod.compute_dtype = jnp.bfloat16
    out1b, pd1b = layer1(x, pos, pos_embed, H, W, pos_size, N_grid, kg1)
    out2b, pd2b = layer2(x, pos, pos_embed, H, W, pos_size, N_grid, kg2)
    jax.block_until_ready((out1b, out2b, pd1b, pd2b))
    assert out1b.shape == (B, Nd, C) and out2b.shape == (B, Nd, C)
    assert bool(jnp.all(jnp.isfinite(out1b))) and bool(jnp.all(jnp.isfinite(out2b)))

    print("KERNEL_OK")
</pallas_src>

<mosaic_0001>
module attributes {stable_mosaic.version = 11 : i64} {
  func.func @_conv3x3_nhwc_kernel(%arg0: i32, %arg1: memref<1x10x10x32xf32, #tpu.memory_space<vmem>>, %arg2: memref<9x32x32xf32, #tpu.memory_space<vmem>>, %arg3: memref<1x32xf32, #tpu.memory_space<vmem>>, %arg4: memref<1x64x32xf32, #tpu.memory_space<vmem>>) attributes {dimension_semantics = [#tpu.dimension_semantics<parallel>], iteration_bounds = array<i64: 2>, scalar_prefetch = 0 : i64, scratch_operands = 0 : i64, tpu.core_type = #tpu.core_type<tc>, window_params = [{transform_indices = @transform_0, window_bounds = array<i64: 1, 10, 10, 32>}, {pipeline_mode = #tpu.pipeline_mode<synchronous>, transform_indices = @transform_1, window_bounds = array<i64: 9, 32, 32>}, {pipeline_mode = #tpu.pipeline_mode<synchronous>, transform_indices = @transform_2, window_bounds = array<i64: 1, 32>}, {transform_indices = @transform_3, window_bounds = array<i64: 1, 64, 32>}]} {
    %c0 = arith.constant 0 : index
    %c0_0 = arith.constant 0 : index
    %c0_1 = arith.constant 0 : index
    %c0_2 = arith.constant 0 : index
    %0 = vector.load %arg1[%c0, %c0_0, %c0_1, %c0_2] : memref<1x10x10x32xf32, #tpu.memory_space<vmem>>, vector<1x8x8x32xf32>
    %1 = vector.shape_cast %0 : vector<1x8x8x32xf32> to vector<8x8x32xf32>
    %2 = vector.shape_cast %1 : vector<8x8x32xf32> to vector<64x32xf32>
    %c0_3 = arith.constant 0 : index
    %c0_4 = arith.constant 0 : index
    %c0_5 = arith.constant 0 : index
    %3 = vector.load %arg2[%c0_3, %c0_4, %c0_5] : memref<9x32x32xf32, #tpu.memory_space<vmem>>, vector<1x32x32xf32>
    %4 = vector.shape_cast %3 : vector<1x32x32xf32> to vector<32x32xf32>
    %cst = arith.constant dense<0.000000e+00> : vector<64x32xf32>
    %5 = tpu.matmul %2, %4, %cst {dimension_numbers = #tpu.dot_dimension_numbers<[1], [0], [0], [1], [0, 0, 1, 1], [], []>} : vector<64x32xf32>, vector<32x32xf32>, vector<64x32xf32> -> vector<64x32xf32>
    %c0_6 = arith.constant 0 : index
    %c0_7 = arith.constant 0 : index
    %c1 = arith.constant 1 : index
    %c0_8 = arith.constant 0 : index
    %6 = vector.load %arg1[%c0_6, %c0_7, %c1, %c0_8] : memref<1x10x10x32xf32, #tpu.memory_space<vmem>>, vector<1x8x8x32xf32>
    %7 = vector.shape_cast %6 : vector<1x8x8x32xf32> to vector<8x8x32xf32>
    %8 = vector.shape_cast %7 : vector<8x8x32xf32> to vector<64x32xf32>
    %c1_9 = arith.constant 1 : index
    %c0_10 = arith.constant 0 : index
    %c0_11 = arith.constant 0 : index
    %9 = vector.load %arg2[%c1_9, %c0_10, %c0_11] : memref<9x32x32xf32, #tpu.memory_space<vmem>>, vector<1x32x32xf32>
    %10 = vector.shape_cast %9 : vector<1x32x32xf32> to vector<32x32xf32>
    %cst_12 = arith.constant dense<0.000000e+00> : vector<64x32xf32>
    %11 = tpu.matmul %8, %10, %cst_12 {dimension_numbers = #tpu.dot_dimension_numbers<[1], [0], [0], [1], [0, 0, 1, 1], [], []>} : vector<64x32xf32>, vector<32x32xf32>, vector<64x32xf32> -> vector<64x32xf32>
    %12 = arith.addf %5, %11 : vector<64x32xf32>
    %c0_13 = arith.constant 0 : index
    %c0_14 = arith.constant 0 : index
    %c2 = arith.constant 2 : index
    %c0_15 = arith.constant 0 : index
    %13 = vector.load %arg1[%c0_13, %c0_14, %c2, %c0_15] : memref<1x10x10x32xf32, #tpu.memory_space<vmem>>, vector<1x8x8x32xf32>
    %14 = vector.shape_cast %13 : vector<1x8x8x32xf32> to vector<8x8x32xf32>
    %15 = vector.shape_cast %14 : vector<8x8x32xf32> to vector<64x32xf32>
    %c2_16 = arith.constant 2 : index
    %c0_17 = arith.constant 0 : index
    %c0_18 = arith.constant 0 : index
    %16 = vector.load %arg2[%c2_16, %c0_17, %c0_18] : memref<9x32x32xf32, #tpu.memory_space<vmem>>, vector<1x32x32xf32>
    %17 = vector.shape_cast %16 : vector<1x32x32xf32> to vector<32x32xf32>
    %cst_19 = arith.constant dense<0.000000e+00> : vector<64x32xf32>
    %18 = tpu.matmul %15, %17, %cst_19 {dimension_numbers = #tpu.dot_dimension_numbers<[1], [0], [0], [1], [0, 0, 1, 1], [], []>} : vector<64x32xf32>, vector<32x32xf32>, vector<64x32xf32> -> vector<64x32xf32>
    %19 = arith.addf %12, %18 : vector<64x32xf32>
    %c0_20 = arith.constant 0 : index
    %c1_21 = arith.constant 1 : index
    %c0_22 = arith.constant 0 : index
    %c0_23 = arith.constant 0 : index
    %20 = vector.load %arg1[%c0_20, %c1_21, %c0_22, %c0_23] : memref<1x10x10x32xf32, #tpu.memory_space<vmem>>, vector<1x8x8x32xf32>
    %21 = vector.shape_cast %20 : vector<1x8x8x32xf32> to vector<8x8x32xf32>
    %22 = vector.shape_cast %21 : vector<8x8x32xf32> to vector<64x32xf32>
    %c3 = arith.constant 3 : index
    %c0_24 = arith.constant 0 : index
    %c0_25 = arith.constant 0 : index
    %23 = vector.load %arg2[%c3, %c0_24, %c0_25] : memref<9x32x32xf32, #tpu.memory_space<vmem>>, vector<1x32x32xf32>
    %24 = vector.shape_cast %23 : vector<1x32x32xf32> to vector<32x32xf32>
    %cst_26 = arith.constant dense<0.000000e+00> : vector<64x32xf32>
    %25 = tpu.matmul %22, %24, %cst_26 {dimension_numbers = #tpu.dot_dimension_numbers<[1], [0], [0], [1], [0, 0, 1, 1], [], []>} : vector<64x32xf32>, vector<32x32xf32>, vector<64x32xf32> -> vector<64x32xf32>
    %26 = arith.addf %19, %25 : vector<64x32xf32>
    %c0_27 = arith.constant 0 : index
    %c1_28 = arith.constant 1 : index
    %c1_29 = arith.constant 1 : index
    %c0_30 = arith.constant 0 : index
    %27 = vector.load %arg1[%c0_27, %c1_28, %c1_29, %c0_30] : memref<1x10x10x32xf32, #tpu.memory_space<vmem>>, vector<1x8x8x32xf32>
    %28 = vector.shape_cast %27 : vector<1x8x8x32xf32> to vector<8x8x32xf32>
    %29 = vector.shape_cast %28 : vector<8x8x32xf32> to vector<64x32xf32>
    %c4 = arith.constant 4 : index
    %c0_31 = arith.constant 0 : index
    %c0_32 = arith.constant 0 : index
    %30 = vector.load %arg2[%c4, %c0_31, %c0_32] : memref<9x32x32xf32, #tpu.memory_space<vmem>>, vector<1x32x32xf32>
    %31 = vector.shape_cast %30 : vector<1x32x32xf32> to vector<32x32xf32>
    %cst_33 = arith.constant dense<0.000000e+00> : vector<64x32xf32>
    %32 = tpu.matmul %29, %31, %cst_33 {dimension_numbers = #tpu.dot_dimension_numbers<[1], [0], [0], [1], [0, 0, 1, 1], [], []>} : vector<64x32xf32>, vector<32x32xf32>, vector<64x32xf32> -> vector<64x32xf32>
    %33 = arith.addf %26, %32 : vector<64x32xf32>
    %c0_34 = arith.constant 0 : index
    %c1_35 = arith.constant 1 : index
    %c2_36 = arith.constant 2 : index
    %c0_37 = arith.constant 0 : index
    %34 = vector.load %arg1[%c0_34, %c1_35, %c2_36, %c0_37] : memref<1x10x10x32xf32, #tpu.memory_space<vmem>>, vector<1x8x8x32xf32>
    %35 = vector.shape_cast %34 : vector<1x8x8x32xf32> to vector<8x8x32xf32>
    %36 = vector.shape_cast %35 : vector<8x8x32xf32> to vector<64x32xf32>
    %c5 = arith.constant 5 : index
    %c0_38 = arith.constant 0 : index
    %c0_39 = arith.constant 0 : index
    %37 = vector.load %arg2[%c5, %c0_38, %c0_39] : memref<9x32x32xf32, #tpu.memory_space<vmem>>, vector<1x32x32xf32>
    %38 = vector.shape_cast %37 : vector<1x32x32xf32> to vector<32x32xf32>
    %cst_40 = arith.constant dense<0.000000e+00> : vector<64x32xf32>
    %39 = tpu.matmul %36, %38, %cst_40 {dimension_numbers = #tpu.dot_dimension_numbers<[1], [0], [0], [1], [0, 0, 1, 1], [], []>} : vector<64x32xf32>, vector<32x32xf32>, vector<64x32xf32> -> vector<64x32xf32>
    %40 = arith.addf %33, %39 : vector<64x32xf32>
    %c0_41 = arith.constant 0 : index
    %c2_42 = arith.constant 2 : index
    %c0_43 = arith.constant 0 : index
    %c0_44 = arith.constant 0 : index
    %41 = vector.load %arg1[%c0_41, %c2_42, %c0_43, %c0_44] : memref<1x10x10x32xf32, #tpu.memory_space<vmem>>, vector<1x8x8x32xf32>
    %42 = vector.shape_cast %41 : vector<1x8x8x32xf32> to vector<8x8x32xf32>
    %43 = vector.shape_cast %42 : vector<8x8x32xf32> to vector<64x32xf32>
    %c6 = arith.constant 6 : index
    %c0_45 = arith.constant 0 : index
    %c0_46 = arith.constant 0 : index
    %44 = vector.load %arg2[%c6, %c0_45, %c0_46] : memref<9x32x32xf32, #tpu.memory_space<vmem>>, vector<1x32x32xf32>
    %45 = vector.shape_cast %44 : vector<1x32x32xf32> to vector<32x32xf32>
    %cst_47 = arith.constant dense<0.000000e+00> : vector<64x32xf32>
    %46 = tpu.matmul %43, %45, %cst_47 {dimension_numbers = #tpu.dot_dimension_numbers<[1], [0], [0], [1], [0, 0, 1, 1], [], []>} : vector<64x32xf32>, vector<32x32xf32>, vector<64x32xf32> -> vector<64x32xf32>
    %47 = arith.addf %40, %46 : vector<64x32xf32>
    %c0_48 = arith.constant 0 : index
    %c2_49 = arith.constant 2 : index
    %c1_50 = arith.constant 1 : index
    %c0_51 = arith.constant 0 : index
    %48 = vector.load %arg1[%c0_48, %c2_49, %c1_50, %c0_51] : memref<1x10x10x32xf32, #tpu.memory_space<vmem>>, vector<1x8x8x32xf32>
    %49 = vector.shape_cast %48 : vector<1x8x8x32xf32> to vector<8x8x32xf32>
    %50 = vector.shape_cast %49 : vector<8x8x32xf32> to vector<64x32xf32>
    %c7 = arith.constant 7 : index
    %c0_52 = arith.constant 0 : index
    %c0_53 = arith.constant 0 : index
    %51 = vector.load %arg2[%c7, %c0_52, %c0_53] : memref<9x32x32xf32, #tpu.memory_space<vmem>>, vector<1x32x32xf32>
    %52 = vector.shape_cast %51 : vector<1x32x32xf32> to vector<32x32xf32>
    %cst_54 = arith.constant dense<0.000000e+00> : vector<64x32xf32>
    %53 = tpu.matmul %50, %52, %cst_54 {dimension_numbers = #tpu.dot_dimension_numbers<[1], [0], [0], [1], [0, 0, 1, 1], [], []>} : vector<64x32xf32>, vector<32x32xf32>, vector<64x32xf32> -> vector<64x32xf32>
    %54 = arith.addf %47, %53 : vector<64x32xf32>
    %c0_55 = arith.constant 0 : index
    %c2_56 = arith.constant 2 : index
    %c2_57 = arith.constant 2 : index
    %c0_58 = arith.constant 0 : index
    %55 = vector.load %arg1[%c0_55, %c2_56, %c2_57, %c0_58] : memref<1x10x10x32xf32, #tpu.memory_space<vmem>>, vector<1x8x8x32xf32>
    %56 = vector.shape_cast %55 : vector<1x8x8x32xf32> to vector<8x8x32xf32>
    %57 = vector.shape_cast %56 : vector<8x8x32xf32> to vector<64x32xf32>
    %c8 = arith.constant 8 : index
    %c0_59 = arith.constant 0 : index
    %c0_60 = arith.constant 0 : index
    %58 = vector.load %arg2[%c8, %c0_59, %c0_60] : memref<9x32x32xf32, #tpu.memory_space<vmem>>, vector<1x32x32xf32>
    %59 = vector.shape_cast %58 : vector<1x32x32xf32> to vector<32x32xf32>
    %cst_61 = arith.constant dense<0.000000e+00> : vector<64x32xf32>
    %60 = tpu.matmul %57, %59, %cst_61 {dimension_numbers = #tpu.dot_dimension_numbers<[1], [0], [0], [1], [0, 0, 1, 1], [], []>} : vector<64x32xf32>, vector<32x32xf32>, vector<64x32xf32> -> vector<64x32xf32>
    %61 = arith.addf %54, %60 : vector<64x32xf32>
    %c0_62 = arith.constant 0 : index
    %c0_63 = arith.constant 0 : index
    %62 = vector.load %arg3[%c0_62, %c0_63] : memref<1x32xf32, #tpu.memory_space<vmem>>, vector<1x32xf32>
    %63 = vector.broadcast %62 : vector<1x32xf32> to vector<64x32xf32>
    %64 = arith.addf %61, %63 : vector<64x32xf32>
    %c0_64 = arith.constant 0 : index
    %c0_65 = arith.constant 0 : index
    %c0_66 = arith.constant 0 : index
    %65 = vector.load %arg4[%c0_64, %c0_65, %c0_66] : memref<1x64x32xf32, #tpu.memory_space<vmem>>, vector<1x64x32xf32>
    %66 = vector.shape_cast %65 : vector<1x64x32xf32> to vector<64x32xf32>
    %67 = vector.shape_cast %64 : vector<64x32xf32> to vector<1x64x32xf32>
    tpu.vector_store %arg4[%c0_64, %c0_65, %c0_66], %67 {strides = array<i32>} : memref<1x64x32xf32, #tpu.memory_space<vmem>>, vector<1x64x32xf32>,
    return
  }
  func.func @transform_0(%arg0: i32) -> (i32, i32, i32, i32) {
    %c0_i32 = arith.constant 0 : i32
    %c0_i32_0 = arith.constant 0 : i32
    %c0_i32_1 = arith.constant 0 : i32
    %c0_i32_2 = arith.constant 0 : i32
    return %arg0, %c0_i32, %c0_i32_0, %c0_i32_1 : i32, i32, i32, i32
  }
  func.func @transform_1(%arg0: i32) -> (i32, i32, i32) {
    %c0_i32 = arith.constant 0 : i32
    %c0_i32_0 = arith.constant 0 : i32
    %c0_i32_1 = arith.constant 0 : i32
    %c0_i32_2 = arith.constant 0 : i32
    return %c0_i32, %c0_i32_0, %c0_i32_1 : i32, i32, i32
  }
  func.func @transform_2(%arg0: i32) -> (i32, i32) {
    %c0_i32 = arith.constant 0 : i32
    %c0_i32_0 = arith.constant 0 : i32
    %c0_i32_1 = arith.constant 0 : i32
    return %c0_i32, %c0_i32_0 : i32, i32
  }
  func.func @transform_3(%arg0: i32) -> (i32, i32, i32) {
    %c0_i32 = arith.constant 0 : i32
    %c0_i32_0 = arith.constant 0 : i32
    %c0_i32_1 = arith.constant 0 : i32
    return %arg0, %c0_i32, %c0_i32_0 : i32, i32, i32
  }
}

module attributes {stable_mosaic.version = 11 : i64} {
  func.func @_matmul_kernel(%arg0: i32, %arg1: i32, %arg2: i32, %arg3: memref<128x288xf32, #tpu.memory_space<vmem>>, %arg4: memref<288x32xf32, #tpu.memory_space<vmem>>, %arg5: memref<1x32xf32, #tpu.memory_space<vmem>>, %arg6: memref<128x32xf32, #tpu.memory_space<vmem>>, %arg7: memref<128x32xf32, #tpu.memory_space<vmem>>) attributes {dimension_semantics = [#tpu.dimension_semantics<parallel>, #tpu.dimension_semantics<parallel>, #tpu.dimension_semantics<arbitrary>], iteration_bounds = array<i64: 1, 1, 1>, scalar_prefetch = 0 : i64, scratch_operands = 1 : i64, tpu.core_type = #tpu.core_type<tc>, window_params = [{transform_indices = @transform_0, window_bounds = array<i64: 128, 288>}, {transform_indices = @transform_1, window_bounds = array<i64: 288, 32>}, {transform_indices = @transform_2, window_bounds = array<i64: 1, 32>}, {transform_indices = @transform_3, window_bounds = array<i64: 128, 32>}]} {
    %c0_i32 = arith.constant 0 : i32
    %0 = arith.cmpi eq, %arg2, %c0_i32 : i32
    %1 = arith.extui %0 : i1 to i32
    %c0_i32_0 = arith.constant 0 : i32
    %2 = arith.cmpi ne, %1, %c0_i32_0 : i32
    scf.if %2 {
      %cst_10 = arith.constant 0.000000e+00 : f32
      %12 = vector.broadcast %cst_10 : f32 to vector<128x32xf32>
      %c0_11 = arith.constant 0 : index
      %c0_12 = arith.constant 0 : index
      %13 = vector.load %arg7[%c0_11, %c0_12] : memref<128x32xf32, #tpu.memory_space<vmem>>, vector<128x32xf32>
      tpu.vector_store %arg7[%c0_11, %c0_12], %12 {strides = array<i32>} : memref<128x32xf32, #tpu.memory_space<vmem>>, vector<128x32xf32>,
    } else {
    }
    %c0 = arith.constant 0 : index
    %c0_1 = arith.constant 0 : index
    %3 = vector.load %arg7[%c0, %c0_1] : memref<128x32xf32, #tpu.memory_space<vmem>>, vector<128x32xf32>
    %c0_2 = arith.constant 0 : index
    %c0_3 = arith.constant 0 : index
    %4 = vector.load %arg3[%c0_2, %c0_3] : memref<128x288xf32, #tpu.memory_space<vmem>>, vector<128x288xf32>
    %c0_4 = arith.constant 0 : index
    %c0_5 = arith.constant 0 : index
    %5 = vector.load %arg4[%c0_4, %c0_5] : memref<288x32xf32, #tpu.memory_space<vmem>>, vector<288x32xf32>
    %cst = arith.constant dense<0.000000e+00> : vector<128x32xf32>
    %6 = tpu.matmul %4, %5, %cst {dimension_numbers = #tpu.dot_dimension_numbers<[1], [0], [0], [1], [0, 0, 1, 1], [], []>} : vector<128x288xf32>, vector<288x32xf32>, vector<128x32xf32> -> vector<128x32xf32>
    %7 = arith.addf %3, %6 : vector<128x32xf32>
    %c0_6 = arith.constant 0 : index
    %c0_7 = arith.constant 0 : index
    %8 = vector.load %arg7[%c0_6, %c0_7] : memref<128x32xf32, #tpu.memory_space<vmem>>, vector<128x32xf32>
    tpu.vector_store %arg7[%c0_6, %c0_7], %7 {strides = array<i32>} : memref<128x32xf32, #tpu.memory_space<vmem>>, vector<128x32xf32>,
    %c0_i32_8 = arith.constant 0 : i32
    %9 = arith.cmpi eq, %arg2, %c0_i32_8 : i32
    %10 = arith.extui %9 : i1 to i32
    %c0_i32_9 = arith.constant 0 : i32
    %11 = arith.cmpi ne, %10, %c0_i32_9 : i32
    scf.if %11 {
      %c0_10 = arith.constant 0 : index
      %c0_11 = arith.constant 0 : index
      %12 = vector.load %arg7[%c0_10, %c0_11] : memref<128x32xf32, #tpu.memory_space<vmem>>, vector<128x32xf32>
      %c0_12 = arith.constant 0 : index
      %c0_13 = arith.constant 0 : index
      %13 = vector.load %arg5[%c0_12, %c0_13] : memref<1x32xf32, #tpu.memory_space<vmem>>, vector<1x32xf32>
      %14 = vector.broadcast %13 : vector<1x32xf32> to vector<128x32xf32>
      %15 = arith.addf %12, %14 : vector<128x32xf32>
      %c0_14 = arith.constant 0 : index
      %c0_15 = arith.constant 0 : index
      %16 = vector.load %arg6[%c0_14, %c0_15] : memref<128x32xf32, #tpu.memory_space<vmem>>, vector<128x32xf32>
      tpu.vector_store %arg6[%c0_14, %c0_15], %15 {strides = array<i32>} : memref<128x32xf32, #tpu.memory_space<vmem>>, vector<128x32xf32>,
    } else {
    }
    return
  }
  func.func @transform_0(%arg0: i32, %arg1: i32, %arg2: i32) -> (i32, i32) {
    %c0_i32 = arith.constant 0 : i32
    return %arg0, %arg2 : i32, i32
  }
  func.func @transform_1(%arg0: i32, %arg1: i32, %arg2: i32) -> (i32, i32) {
    %c0_i32 = arith.constant 0 : i32
    return %arg2, %arg1 : i32, i32
  }
  func.func @transform_2(%arg0: i32, %arg1: i32, %arg2: i32) -> (i32, i32) {
    %c0_i32 = arith.constant 0 : i32
    %c0_i32_0 = arith.constant 0 : i32
    return %c0_i32, %arg1 : i32, i32
  }
  func.func @transform_3(%arg0: i32, %arg1: i32, %arg2: i32) -> (i32, i32) {
    %c0_i32 = arith.constant 0 : i32
    return %arg0, %arg1 : i32, i32
  }
}

</mosaic_0001>

<bundles_post_ra>
// kernel: tpu_custom_call.1
= control target key start
LH: loop header
LB: loop body
LE: loop exit
PB: predicated region body
PF: predicated region fallthrough
CT: control target
= control target key end

     0   :  { %s2082_s12 = smov 0   ;;  %s2447_s0 = inlined_call_operand.vmem [shape: f32[2,10,10,32], index: 0, kind: input, shape index: {}]   ;;  %s2448_s1 = inlined_call_operand.vmem [shape: f32[9,32,32], index: 1, kind: input, shape index: {}]   ;;  %s2449_s2 = inlined_call_operand.vmem [shape: f32[1,32], index: 2, kind: input, shape index: {}]   ;;  %s2450_s3 = inlined_call_operand.vmem [shape: f32[2,64,32], index: 3, kind: output, shape index: {}]  }
   0x1 LB: > { %s1585_s13 = sadd.s32 4294967295, %s2060_s12   ;;  %p1589_p0 = scmp.ge.s32.totalorder %s2060_s12, 1  ;;  %s2060_s12 = sphi %s2082_s12, %s13_s12  }
   0x2   : > { %p137_p1 = scmp.lt.s32.totalorder %s2060_s12, 3 }
   0x4   : > { %p138_p2 = pnand %p1589_p0, %p137_p1 }
   0x5   : > { %p161_p3 = scmp.lt.s32.totalorder (!%p138_p2), %s1585_s13, 1 }
   0x6   : > { %141 = sbr.rel (%p138_p2) target bundleno = 294 (0x126), region = 32 }
   0xb   : > { %v1596_v0 = vld [vmem:[%s2448_s1 + $0x38] sm:$0xff]  ;;  %v1595_v1 = vld [vmem:[%s2448_s1 + $0x30] sm:$0xff]  ;;  %v1594_v2 = vld [vmem:[%s2448_s1 + $0x28] sm:$0xff]  ;;  %s2452_s13 = smov (!%p161_p3, %s1585_s13), 1  ;;  %vm196_vm0 = vcmask 261120  }
   0xc   : > { %2037 = vmatprep.subr.mxu1 %v1596_v0  ;;  %1857 = vmatprep.subr.mxu0 %v1596_v0  ;;  %v1593_v3 = vld [vmem:[%s2448_s1 + $0x20] sm:$0xff]  ;;  %s2045_s22 = smul.u32 160, %s2452_s13  ;;  %v182_v4 = vld [vmem:[%s2448_s1 + $0x18] sm:$0xff]  ;;  %v181_v10 = vld [vmem:[%s2448_s1 + $0x10] sm:$0xff] }
   0xd   : > { %2041 = vmatpush3.msra.mxu1 %v1596_v0  ;;  %1858 = vmatpush3.msra.mxu0 %v1596_v0  ;;  %v1616_v9 = vld [vmem:[%s2448_s1 + $0x58] sm:$0xff]  ;;  %v1615_v12 = vld [vmem:[%s2448_s1 + $0x50] sm:$0xff]  ;;  %v180_v15 = vld [vmem:[%s2448_s1 + $0x8] sm:$0xff] }
   0xe   : > { %2038 = vmatprep.subr.mxu1 %v1595_v1  ;;  %1859 = vmatprep.subr.mxu0 %v1595_v1  ;;  %s2108_s25 = scalar_lea.vmem %s2447_s0, %s2045_s22  ;;  %v1614_v17 = vld [vmem:[%s2448_s1 + $0x48] sm:$0xff]  ;;  %v179_v18 = vld [vmem:[%s2448_s1] sm:$0xff]  ;;  %v1636_v23 = vld [vmem:[%s2448_s1 + $0x78] sm:$0xff] }
   0xf   : > { %2042 = vmatpush3.msra.mxu1 %v1595_v1  ;;  %1860 = vmatpush3.msra.mxu0 %v1595_v1  ;;  %v2114_v5 = vld [vmem:[%s2108_s25 + $0x41] sm:$0xff]  ;;  %v2118_v7 = vld [vmem:[%s2108_s25 + $0x51] sm:$0xff] }
  0x10   : > { %2039 = vmatprep.subr.mxu1 %v1594_v2  ;;  %1861 = vmatprep.subr.mxu0 %v1594_v2  ;;  %v183_v6 = vld [vmem:[%s2108_s25 + $0x1] sm:$0xff]  ;;  %v2123_v8 = vld [vmem:[%s2108_s25 + $0x11] sm:$0xff] }
  0x11   : > { %2043 = vmatpush3.msra.mxu1 %v1594_v2  ;;  %1862 = vmatpush3.msra.mxu0 %v1594_v2  ;;  %v2135_v11 = vld [vmem:[%s2108_s25 + $0x61] sm:$0xff]  ;;  %v2146_v14 = vld [vmem:[%s2108_s25 + $0x71] sm:$0xff] }
  0x12   : > { %2040 = vmatprep.subr.mxu1 %v1593_v3  ;;  %1863 = vmatprep.subr.mxu0 %v1593_v3  ;;  %v2143_v13 = vld [vmem:[%s2108_s25 + $0x21] sm:$0xff]  ;;  %v2154_v16 = vld [vmem:[%s2108_s25 + $0x31] sm:$0xff] }
  0x13   : > { %2044 = vmatpush3.msra.mxu1 %v1593_v3  ;;  %1871 = vmatprep.mubr.msk.f32.mxu1 %vm196_vm0, %v2114_v5  ;;  %v171_v19 = vld [vmem:[%s2108_s25] sm:$0xff]  ;;  %v172_v21 = vld [vmem:[%s2108_s25 + $0x10] sm:$0xff]  ;;  %v1656_v25 = vld [vmem:[%s2448_s1 + $0x98] sm:$0xff] }
  0x14   : > { %1864 = vmatpush3.msra.mxu0 %v1593_v3  ;;  %1865 = vmatprep.mubr.msk.f32.mxu0 %vm196_vm0, %v183_v6  ;;  %v1613_v20 = vld [vmem:[%s2448_s1 + $0x40] sm:$0xff]  ;;  %v2179_v24 = vld [vmem:[%s2108_s25 + $0x12] sm:$0xff]  ;;  %v1634_v35 = vld [vmem:[%s2448_s1 + $0x68] sm:$0xff] }
  0x15   : > { %1872 = vmatmul.mubr.msk.f32.vlgmr.msra.gmra.mxu1 %vm196_vm0, %v2118_v7  ;;  %1877 = vmatprep.subr.mxu1 %v182_v4  ;;  %v455_v22 = vld [vmem:[%s2108_s25 + $0x2] sm:$0xff]  ;;  %v2190_v27 = vld [vmem:[%s2108_s25 + $0x30] sm:$0xff]  ;;  %v1676_v44 = vld [vmem:[%s2448_s1 + $0xb8] sm:$0xff] }
  0x16   : > { %1866 = vmatmul.mubr.msk.f32.vlgmr.msra.gmra.mxu0 %vm196_vm0, %v2123_v8  ;;  %1878 = vmatpush3.msra.mxu1 %v182_v4  ;;  %v2186_v26 = vld [vmem:[%s2108_s25 + $0x20] sm:$0xff]  ;;  %v1635_v29 = vld [vmem:[%s2448_s1 + $0x70] sm:$0xff]  ;;  %v1654_v37 = vld [vmem:[%s2448_s1 + $0x88] sm:$0xff] }
  0x17   : > { %1897 = vmatprep.subr.mxu0 %v1616_v9  ;;  %1879 = vmatprep.subr.mxu1 %v181_v10  ;;  %v2195_v28 = vld [vmem:[%s2108_s25 + $0x22] sm:$0xff]  ;;  %v2203_v30 = vld [vmem:[%s2108_s25 + $0x32] sm:$0xff] }
  0x18   : > { %1898 = vmatpush3.msra.mxu0 %v1616_v9  ;;  %1874 = vmatprep.mubr.msk.f32.mxu1 %vm196_vm0, %v2135_v11  ;;  %v1655_v31 = vld [vmem:[%s2448_s1 + $0x90] sm:$0xff]  ;;  %v2211_v32 = vld [vmem:[%s2108_s25 + $0x40] sm:$0xff]  ;;  %v1696_v45 = vld [vmem:[%s2448_s1 + $0xd8] sm:$0xff] }
  0x19   : > { %1880 = vmatpush3.msra.mxu1 %v181_v10  ;;  %1899 = vmatprep.subr.mxu0 %v1615_v12  ;;  %v2216_v33 = vld [vmem:[%s2108_s25 + $0x50] sm:$0xff]  ;;  %v2221_v34 = vld [vmem:[%s2108_s25 + $0x42] sm:$0xff]  ;;  %v1716_v54 = vld [vmem:[%s2448_s1 + $0xf8] sm:$0xff] }
  0x1a   : > { %1868 = vmatprep.mubr.msk.f32.mxu0 %vm196_vm0, %v2143_v13  ;;  %1875 = vmatmul.mubr.msk.f32.gmra.mxu1 %vm196_vm0, %v2146_v14  ;;  %v2229_v36 = vld [vmem:[%s2108_s25 + $0x52] sm:$0xff]  ;;  %v2237_v38 = vld [vmem:[%s2108_s25 + $0x60] sm:$0xff]  ;;  %v1674_v48 = vld [vmem:[%s2448_s1 + $0xa8] sm:$0xff] }
  0x1b   : > { %1881 = vmatprep.subr.mxu1 %v180_v15  ;;  %1900 = vmatpush3.msra.mxu0 %v1615_v12  ;;  %v2242_v39 = vld [vmem:[%s2108_s25 + $0x70] sm:$0xff]  ;;  %v2247_v40 = vld [vmem:[%s2108_s25 + $0x62] sm:$0xff]  ;;  %v1736_v55 = vld [vmem:[%s2448_s1 + $0x118] sm:$0xff] }
  0x1c   : > { %1869 = vmatmul.mubr.msk.f32.gmra.mxu0 %vm196_vm0, %v2154_v16  ;;  %1882 = vmatpush3.msra.mxu1 %v180_v15  ;;  %v1633_v41 = vld [vmem:[%s2448_s1 + $0x60] sm:$0xff]  ;;  %v2255_v42 = vld [vmem:[%s2108_s25 + $0x72] sm:$0xff]  ;;  %v1694_v49 = vld [vmem:[%s2448_s1 + $0xc8] sm:$0xff] }
  0x1d   : > { %1901 = vmatprep.subr.mxu0 %v1614_v17  ;;  %1883 = vmatprep.subr.mxu1 %v179_v18  ;;  %v1653_v43 = vld [vmem:[%s2448_s1 + $0x80] sm:$0xff]  ;;  %v1675_v46 = vld [vmem:[%s2448_s1 + $0xb0] sm:$0xff]  ;;  %v1714_v58 = vld [vmem:[%s2448_s1 + $0xe8] sm:$0xff] }
  0x1e   : > { %1902 = vmatpush3.msra.mxu0 %v1614_v17  ;;  %1884 = vmatpush3.msra.mxu1 %v179_v18  ;;  %v1695_v47 = vld [vmem:[%s2448_s1 + $0xd0] sm:$0xff]  ;;  %v1632_v50 = vld [vmem:[%s2108_s25 + $0x80] sm:$0xff]  ;;  %v1734_v59 = vld [vmem:[%s2448_s1 + $0x108] sm:$0xff] }
  0x1f   : > { %1885 = vmatprep.mubr.msk.f32.mxu1 %vm196_vm0, %v171_v19  ;;  %1903 = vmatprep.subr.mxu0 %v1613_v20  ;;  %v1673_v51 = vld [vmem:[%s2448_s1 + $0xa0] sm:$0xff]  ;;  %v1715_v56 = vld [vmem:[%s2448_s1 + $0xf0] sm:$0xff] }
  0x20   : > { %1886 = vmatmul.mubr.msk.f32.vlgmr.msra.gmra.mxu1 %vm196_vm0, %v172_v21  ;;  %1904 = vmatpush3.msra.mxu0 %v1613_v20  ;;  %v2314_v52 = vld [vmem:[%s2108_s25 + $0x81] sm:$0xff]  ;;  %v1735_v57 = vld [vmem:[%s2448_s1 + $0x110] sm:$0xff] }
  0x21   : > { %1905 = vmatprep.mubr.msk.f32.mxu0 %vm196_vm0, %v455_v22  ;;  %1917 = vmatprep.subr.mxu1 %v1636_v23  ;;  %v1693_v53 = vld [vmem:[%s2448_s1 + $0xc0] sm:$0xff]  ;;  %v1692_v62 = vld [vmem:[%s2108_s25 + $0x90] sm:$0xff] }
  0x22   : > { %1906 = vmatmul.mubr.msk.f32.vlgmr.msra.gmra.mxu0 %vm196_vm0, %v2179_v24  ;;  %1918 = vmatpush3.msra.mxu1 %v1636_v23  ;;  %v1672_v60 = vld [vmem:[%s2108_s25 + $0x82] sm:$0xff]  ;;  %v1712_v0 = vld [vmem:[%s2108_s25 + $0x91] sm:$0xff] }
  0x23   : > { %1937 = vmatprep.subr.mxu0 %v1656_v25  ;;  %1888 = vmatprep.mubr.msk.f32.mxu1 %vm196_vm0, %v2186_v26  ;;  %v1713_v61 = vld [vmem:[%s2448_s1 + $0xe0] sm:$0xff]  ;;  %v1732_v1 = vld [vmem:[%s2108_s25 + $0x92] sm:$0xff]  ;;  %s1748_s25 = sshll.u32 %s2452_s13, 6 }
  0x24   : > { %1938 = vmatpush3.msra.mxu0 %v1656_v25  ;;  %1889 = vmatmul.mubr.msk.f32.gmra.mxu1 %vm196_vm0, %v2190_v27  ;;  %v1733_v63 = vld [vmem:[%s2448_s1 + $0x100] sm:$0xff]  ;;  %s2425_s21 = scalar_lea.vmem %s2450_s3, %s1748_s25 }
  0x25   : > { %1908 = vmatprep.mubr.msk.f32.mxu0 %vm196_vm0, %v2195_v28  ;;  %1919 = vmatprep.subr.mxu1 %v1635_v29 }
  0x26   : > { %1909 = vmatmul.mubr.msk.f32.gmra.mxu0 %vm196_vm0, %v2203_v30  ;;  %1920 = vmatpush3.msra.mxu1 %v1635_v29 }
  0x27   : > { %1939 = vmatprep.subr.mxu0 %v1655_v31  ;;  %1891 = vmatprep.mubr.msk.f32.mxu1 %vm196_vm0, %v2211_v32 }
  0x28   : > { %1940 = vmatpush3.msra.mxu0 %v1655_v31  ;;  %1892 = vmatmul.mubr.msk.f32.gmra.mxu1 %vm196_vm0, %v2216_v33 }
  0x29   : > { %1911 = vmatprep.mubr.msk.f32.mxu0 %vm196_vm0, %v2221_v34  ;;  %1921 = vmatprep.subr.mxu1 %v1634_v35 }
  0x2a   : > { %1912 = vmatmul.mubr.msk.f32.gmra.mxu0 %vm196_vm0, %v2229_v36  ;;  %1922 = vmatpush3.msra.mxu1 %v1634_v35 }
  0x2b   : > { %1941 = vmatprep.subr.mxu0 %v1654_v37  ;;  %1894 = vmatprep.mubr.msk.f32.mxu1 %vm196_vm0, %v2237_v38 }
  0x2c   : > { %1942 = vmatpush3.msra.mxu0 %v1654_v37  ;;  %1895 = vmatmul.mubr.msk.f32.gmra.mxu1 %vm196_vm0, %v2242_v39 }
  0x2d   : > { %1914 = vmatprep.mubr.msk.f32.mxu0 %vm196_vm0, %v2247_v40  ;;  %1923 = vmatprep.subr.mxu1 %v1633_v41 }
  0x2e   : > { %1915 = vmatmul.mubr.msk.f32.gmra.mxu0 %vm196_vm0, %v2255_v42  ;;  %1924 = vmatpush3.msra.mxu1 %v1633_v41 }
  0x2f   : > { %1943 = vmatprep.subr.mxu0 %v1653_v43  ;;  %1925 = vmatprep.mubr.msk.f32.mxu1 %vm196_vm0, %v172_v21 }
  0x30   : > { %1944 = vmatpush3.msra.mxu0 %v1653_v43  ;;  %1926 = vmatmul.mubr.msk.f32.vlgmr.msra.gmra.mxu1 %vm196_vm0, %v2186_v26 }
  0x31   : > { %1945 = vmatprep.mubr.msk.f32.mxu0 %vm196_vm0, %v2123_v8  ;;  %1957 = vmatprep.subr.mxu1 %v1676_v44 }
  0x32   : > { %1946 = vmatmul.mubr.msk.f32.vlgmr.msra.gmra.mxu0 %vm196_vm0, %v2143_v13  ;;  %1958 = vmatpush3.msra.mxu1 %v1676_v44 }
  0x33   : > { %1977 = vmatprep.subr.mxu0 %v1696_v45  ;;  %1928 = vmatprep.mubr.msk.f32.mxu1 %vm196_vm0, %v2190_v27 }
  0x34   : > { %1978 = vmatpush3.msra.mxu0 %v1696_v45  ;;  %1929 = vmatmul.mubr.msk.f32.gmra.mxu1 %vm196_vm0, %v2211_v32 }
  0x35   : > { %1948 = vmatprep.mubr.msk.f32.mxu0 %vm196_vm0, %v2154_v16  ;;  %1959 = vmatprep.subr.mxu1 %v1675_v46 }
  0x36   : > { %1949 = vmatmul.mubr.msk.f32.gmra.mxu0 %vm196_vm0, %v2114_v5  ;;  %1960 = vmatpush3.msra.mxu1 %v1675_v46 }
  0x37   : > { %1979 = vmatprep.subr.mxu0 %v1695_v47  ;;  %1931 = vmatprep.mubr.msk.f32.mxu1 %vm196_vm0, %v2216_v33 }
  0x38   : > { %1980 = vmatpush3.msra.mxu0 %v1695_v47  ;;  %1932 = vmatmul.mubr.msk.f32.gmra.mxu1 %vm196_vm0, %v2237_v38 }
  0x39   : > { %1951 = vmatprep.mubr.msk.f32.mxu0 %vm196_vm0, %v2118_v7  ;;  %1961 = vmatprep.subr.mxu1 %v1674_v48 }
  0x3a   : > { %1952 = vmatmul.mubr.msk.f32.gmra.mxu0 %vm196_vm0, %v2135_v11  ;;  %1962 = vmatpush3.msra.mxu1 %v1674_v48 }
  0x3b   : > { %1981 = vmatprep.subr.mxu0 %v1694_v49  ;;  %1934 = vmatprep.mubr.msk.f32.mxu1 %vm196_vm0, %v2242_v39 }
  0x3c   : > { %1982 = vmatpush3.msra.mxu0 %v1694_v49  ;;  %1935 = vmatmul.mubr.msk.f32.gmra.mxu1 %vm196_vm0, %v1632_v50 }
  0x3d   : > { %1954 = vmatprep.mubr.msk.f32.mxu0 %vm196_vm0, %v2146_v14  ;;  %1963 = vmatprep.subr.mxu1 %v1673_v51 }
  0x3e   : > { %1955 = vmatmul.mubr.msk.f32.gmra.mxu0 %vm196_vm0, %v2314_v52  ;;  %1964 = vmatpush3.msra.mxu1 %v1673_v51 }
  0x3f   : > { %1983 = vmatprep.subr.mxu0 %v1693_v53  ;;  %1965 = vmatprep.mubr.msk.f32.mxu1 %vm196_vm0, %v2179_v24 }
  0x40   : > { %1984 = vmatpush3.msra.mxu0 %v1693_v53  ;;  %1966 = vmatmul.mubr.msk.f32.vlgmr.msra.gmra.mxu1 %vm196_vm0, %v2195_v28 }
  0x41   : > { %1985 = vmatprep.mubr.msk.f32.mxu0 %vm196_vm0, %v2186_v26  ;;  %1997 = vmatprep.subr.mxu1 %v1716_v54 }
  0x42   : > { %1986 = vmatmul.mubr.msk.f32.vlgmr.msra.gmra.mxu0 %vm196_vm0, %v2190_v27  ;;  %1998 = vmatpush3.msra.mxu1 %v1716_v54 }
  0x43   : > { %2017 = vmatprep.subr.mxu0 %v1736_v55  ;;  %1968 = vmatprep.mubr.msk.f32.mxu1 %vm196_vm0, %v2203_v30 }
  0x44   : > { %2018 = vmatpush3.msra.mxu0 %v1736_v55  ;;  %1969 = vmatmul.mubr.msk.f32.gmra.mxu1 %vm196_vm0, %v2221_v34 }
  0x45   : > { %1988 = vmatprep.mubr.msk.f32.mxu0 %vm196_vm0, %v2211_v32  ;;  %1999 = vmatprep.subr.mxu1 %v1715_v56 }
  0x46   : > { %1989 = vmatmul.mubr.msk.f32.gmra.mxu0 %vm196_vm0, %v2216_v33  ;;  %2000 = vmatpush3.msra.mxu1 %v1715_v56 }
  0x47   : > { %2019 = vmatprep.subr.mxu0 %v1735_v57  ;;  %1971 = vmatprep.mubr.msk.f32.mxu1 %vm196_vm0, %v2229_v36 }
  0x48   : > { %2020 = vmatpush3.msra.mxu0 %v1735_v57  ;;  %1972 = vmatmul.mubr.msk.f32.gmra.mxu1 %vm196_vm0, %v2247_v40 }
  0x49   : > { %1991 = vmatprep.mubr.msk.f32.mxu0 %vm196_vm0, %v2237_v38  ;;  %2001 = vmatprep.subr.mxu1 %v1714_v58 }
  0x4a   : > { %1992 = vmatmul.mubr.msk.f32.gmra.mxu0 %vm196_vm0, %v2242_v39  ;;  %2002 = vmatpush3.msra.mxu1 %v1714_v58 }
  0x4b   : > { %2021 = vmatprep.subr.mxu0 %v1734_v59  ;;  %1974 = vmatprep.mubr.msk.f32.mxu1 %vm196_vm0, %v2255_v42 }
  0x4c   : > { %2022 = vmatpush3.msra.mxu0 %v1734_v59  ;;  %1975 = vmatmul.mubr.msk.f32.gmra.mxu1 %vm196_vm0, %v1672_v60 }
  0x4d   : > { %1994 = vmatprep.mubr.msk.f32.mxu0 %vm196_vm0, %v1632_v50  ;;  %2003 = vmatprep.subr.mxu1 %v1713_v61 }
  0x4e   : > { %1995 = vmatmul.mubr.msk.f32.gmra.mxu0 %vm196_vm0, %v1692_v62  ;;  %2004 = vmatpush3.msra.mxu1 %v1713_v61 }
  0x4f   : > { %2023 = vmatprep.subr.mxu0 %v1733_v63  ;;  %2005 = vmatprep.mubr.msk.f32.mxu1 %vm196_vm0, %v2143_v13 }
  0x50   : > { %2024 = vmatpush3.msra.mxu0 %v1733_v63  ;;  %2006 = vmatmul.mubr.msk.f32.vlgmr.msra.gmra.mxu1 %vm196_vm0, %v2154_v16 }
  0x51   : > { %2025 = vmatprep.mubr.msk.f32.mxu0 %vm196_vm0, %v2195_v28  ;;  %2008 = vmatprep.mubr.msk.f32.mxu1 %vm196_vm0, %v2114_v5 }
  0x52   : > { %2026 = vmatmul.mubr.msk.f32.vlgmr.msra.gmra.mxu0 %vm196_vm0, %v2203_v30 }
  0x53   : > { %2028 = vmatprep.mubr.msk.f32.mxu0 %vm196_vm0, %v2221_v34 }
  0x54   : > { %2009 = vmatmul.mubr.msk.f32.gmra.mxu1 %vm196_vm0, %v2118_v7 }
  0x55   : > { %2011 = vmatprep.mubr.msk.f32.mxu1 %vm196_vm0, %v2135_v11 }
  0x56   : > { %2029 = vmatmul.mubr.msk.f32.gmra.mxu0 %vm196_vm0, %v2229_v36 }
  0x57   : > { %2031 = vmatprep.mubr.msk.f32.mxu0 %vm196_vm0, %v2247_v40 }
  0x58   : > { %2012 = vmatmul.mubr.msk.f32.gmra.mxu1 %vm196_vm0, %v2146_v14 }
  0x59   : > { %2014 = vmatprep.mubr.msk.f32.mxu1 %vm196_vm0, %v2314_v52 }
  0x5a   : > { %2032 = vmatmul.mubr.msk.f32.gmra.mxu0 %vm196_vm0, %v2255_v42 }
  0x5b   : > { %2034 = vmatprep.mubr.msk.f32.mxu0 %vm196_vm0, %v1672_v60 }
  0x5c   : > { %2015 = vmatmul.mubr.msk.f32.gmra.mxu1 %vm196_vm0, %v1712_v0 }
  0x5e   : > { %2035 = vmatmul.mubr.msk.f32.gmra.mxu0 %vm196_vm0, %v1732_v1 }
  0xd5   : > { %v1873_v2 = vpop.f32.mrf.mxu1 }
  0xd6   : > { %v1867_v3 = vpop.f32.mrf.mxu0 }
  0xd7   : > { %v307_v4 = vpop.f32.mrf.mxu1 }
  0xd8   : > { %v287_v5 = vpop.f32.mrf.mxu0 }
  0xda   : > { %v1876_v6 = vpop.f32.mrf.mxu1 }
  0xdc   : > { %v1870_v7 = vpop.f32.mrf.mxu0  ;;  %v2410_v8 = vpop.f32.mrf.mxu1 }
  0xde   : > { %v297_v9 = vpop.f32.mrf.mxu0 }
  0xe0   : > { %v1887_v10 = vpop.f32.mrf.mxu1 }
  0xe1   : > { %v422_v41 = vadd.f32 %v1887_v10, %v1867_v3 }
  0xe2   : > { %v1907_v11 = vpop.f32.mrf.mxu0  ;;  %v416_v12 = vpop.f32.mrf.mxu1 }
  0xe3   : > { %v417_v44 = vadd.f32 %v416_v12, %v287_v5  ;;  %v598_v47 = vadd.f32 %v1907_v11, %v422_v41 }
  0xe4   : > { %v558_v13 = vpop.f32.mrf.mxu0  ;;  %v1890_v14 = vpop.f32.mrf.mxu1 }
  0xe5   : > { %v432_v48 = vadd.f32 %v1890_v14, %v1870_v7  ;;  %v597_v51 = vadd.f32 %v558_v13, %v417_v44 }
  0xe6   : > { %v1910_v15 = vpop.f32.mrf.mxu0  ;;  %v426_v16 = vpop.f32.mrf.mxu1 }
  0xe7   : > { %v427_v52 = vadd.f32 %v426_v16, %v297_v9  ;;  %v600_v57 = vadd.f32 %v1910_v15, %v432_v48 }
  0xe8   : > { %v568_v17 = vpop.f32.mrf.mxu0  ;;  %v1893_v18 = vpop.f32.mrf.mxu1 }
  0xe9   : > { %v442_v54 = vadd.f32 %v1893_v18, %v1873_v2  ;;  %v599_v62 = vadd.f32 %v568_v17, %v427_v52 }
  0xea   : > { %v1913_v19 = vpop.f32.mrf.mxu0  ;;  %v436_v20 = vpop.f32.mrf.mxu1 }
  0xeb   : > { %v437_v59 = vadd.f32 %v436_v20, %v307_v4  ;;  %v602_v1 = vadd.f32 %v1913_v19, %v442_v54 }
  0xec   : > { %v578_v21 = vpop.f32.mrf.mxu0  ;;  %v1896_v22 = vpop.f32.mrf.mxu1 }
  0xed   : > { %v452_v3 = vadd.f32 %v1896_v22, %v1876_v6  ;;  %v601_v9 = vadd.f32 %v578_v21, %v437_v59 }
  0xee   : > { %v1916_v23 = vpop.f32.mrf.mxu0  ;;  %v446_v24 = vpop.f32.mrf.mxu1 }
  0xef   : > { %v447_v2 = vadd.f32 %v446_v24, %v2410_v8  ;;  %v604_v18 = vadd.f32 %v1916_v23, %v452_v3  ;;  %v1745_v23 = vld [vmem:[%s2449_s2] ss:$0 sm:$0xff] }
  0xf0   : > { %v588_v25 = vpop.f32.mrf.mxu0  ;;  %v1927_v26 = vpop.f32.mrf.mxu1 }
  0xf1   : > { %v749_v53 = vadd.f32 %v1927_v26, %v598_v47 }
  0xf2   : > { %v1947_v27 = vpop.f32.mrf.mxu0  ;;  %v709_v28 = vpop.f32.mrf.mxu1 }
  0xf3   : > { %v748_v58 = vadd.f32 %v709_v28, %v597_v51  ;;  %v899_v63 = vadd.f32 %v1947_v27, %v749_v53  ;;  %v603_v27 = vadd.f32 %v588_v25, %v447_v2 }
  0xf4   : > { %v859_v29 = vpop.f32.mrf.mxu0  ;;  %v1930_v30 = vpop.f32.mrf.mxu1 }
  0xf5   : > { %v751_v0 = vadd.f32 %v1930_v30, %v600_v57  ;;  %v898_v10 = vadd.f32 %v859_v29, %v748_v58 }
  0xf6   : > { %v1950_v31 = vpop.f32.mrf.mxu0  ;;  %v719_v32 = vpop.f32.mrf.mxu1 }
  0xf7   : > { %v750_v11 = vadd.f32 %v719_v32, %v599_v62  ;;  %v901_v16 = vadd.f32 %v1950_v31, %v751_v0 }
  0xf8   : > { %v869_v33 = vpop.f32.mrf.mxu0  ;;  %v1933_v34 = vpop.f32.mrf.mxu1 }
  0xf9   : > { %v753_v13 = vadd.f32 %v1933_v34, %v602_v1  ;;  %v900_v19 = vadd.f32 %v869_v33, %v750_v11 }
  0xfa   : > { %v1953_v35 = vpop.f32.mrf.mxu0  ;;  %v729_v36 = vpop.f32.mrf.mxu1 }
  0xfb   : > { %v752_v17 = vadd.f32 %v729_v36, %v601_v9  ;;  %v903_v28 = vadd.f32 %v1953_v35, %v753_v13 }
  0xfc   : > { %v879_v37 = vpop.f32.mrf.mxu0  ;;  %v1936_v38 = vpop.f32.mrf.mxu1 }
  0xfd   : > { %v755_v29 = vadd.f32 %v1936_v38, %v604_v18  ;;  %v902_v34 = vadd.f32 %v879_v37, %v752_v17 }
  0xfe   : > { %v2412_v39 = vpop.f32.mrf.mxu0  ;;  %v739_v40 = vpop.f32.mrf.mxu1 }
  0xff   : > { %v754_v31 = vadd.f32 %v739_v40, %v603_v27  ;;  %v905_v35 = vadd.f32 %v2412_v39, %v755_v29 }
 0x100   : > { %v2414_v42 = vpop.f32.mrf.mxu0  ;;  %v1967_v43 = vpop.f32.mrf.mxu1 }
 0x101   : > { %v1049_v12 = vadd.f32 %v1967_v43, %v899_v63 }
 0x102   : > { %v1987_v45 = vpop.f32.mrf.mxu0  ;;  %v1009_v46 = vpop.f32.mrf.mxu1 }
 0x103   : > { %v1048_v4 = vadd.f32 %v1009_v46, %v898_v10  ;;  %v1200_v6 = vadd.f32 %v1987_v45, %v1049_v12 }
 0x104   : > { %v1160_v49 = vpop.f32.mrf.mxu0  ;;  %v1970_v50 = vpop.f32.mrf.mxu1 }
 0x105   : > { %v1051_v22 = vadd.f32 %v1970_v50, %v901_v16  ;;  %v1199_v32 = vadd.f32 %v1160_v49, %v1048_v4  ;;  %v904_v49 = vadd.f32 %v2414_v42, %v754_v31 }
 0x106   : > { %v1990_v55 = vpop.f32.mrf.mxu0  ;;  %v1019_v56 = vpop.f32.mrf.mxu1 }
 0x107   : > { %v1050_v8 = vadd.f32 %v1019_v56, %v900_v19  ;;  %v1202_v36 = vadd.f32 %v1990_v55, %v1051_v22 }
 0x108   : > { %v1170_v60 = vpop.f32.mrf.mxu0  ;;  %v1973_v61 = vpop.f32.mrf.mxu1 }
 0x109   : > { %v1053_v41 = vadd.f32 %v1973_v61, %v903_v28  ;;  %v1201_v45 = vadd.f32 %v1170_v60, %v1050_v8 }
 0x10a   : > { %v1993_v5 = vpop.f32.mrf.mxu0  ;;  %v1029_v7 = vpop.f32.mrf.mxu1 }
 0x10b   : > { %v1052_v38 = vadd.f32 %v1029_v7, %v902_v34  ;;  %v1204_v50 = vadd.f32 %v1993_v5, %v1053_v41 }
 0x10c   : > { %v1180_v14 = vpop.f32.mrf.mxu0  ;;  %v1976_v15 = vpop.f32.mrf.mxu1 }
 0x10d   : > { %v1055_v39 = vadd.f32 %v1976_v15, %v905_v35  ;;  %v1203_v56 = vadd.f32 %v1180_v14, %v1052_v38 }
 0x10e   : > { %v1996_v20 = vpop.f32.mrf.mxu0  ;;  %v1039_v26 = vpop.f32.mrf.mxu1 }
 0x10f   : > { %v1054_v59 = vadd.f32 %v1039_v26, %v904_v49  ;;  %v1206_v0 = vadd.f32 %v1996_v20, %v1055_v39 }
 0x110   : > { %v1190_v30 = vpop.f32.mrf.mxu0  ;;  %v2007_v21 = vpop.f32.mrf.mxu1 }
 0x111   : > { %v1350_v24 = vadd.f32 %v2007_v21, %v1200_v6  ;;  %v1205_v11 = vadd.f32 %v1190_v30, %v1054_v59 }
 0x112   : > { %v2027_v43 = vpop.f32.mrf.mxu0  ;;  %v1310_v33 = vpop.f32.mrf.mxu1 }
 0x113   : > { %v1500_v44 = vadd.f32 %v2027_v43, %v1350_v24  ;;  %v1349_v25 = vadd.f32 %v1310_v33, %v1199_v32 }
 0x114   : > { %v1460_v37 = vpop.f32.mrf.mxu0  ;;  %v2010_v40 = vpop.f32.mrf.mxu1 }
 0x115   : > { %v1515_v46 = vadd.f32 %v1745_v23, %v1500_v44  ;;  %v1499_v47 = vadd.f32 %v1460_v37, %v1349_v25  ;;  %v1352_v48 = vadd.f32 %v2010_v40, %v1202_v36 }
 0x116   : > { %v2030_v51 = vpop.f32.mrf.mxu0  ;;  %v1320_v52 = vpop.f32.mrf.mxu1 }
 0x117   : > { %1523 = vst.msk [vmem:[%s2425_s21 + $0x8] sm:$0xff] %vm196_vm0, %v1515_v46  ;;  %v1514_v53 = vadd.f32 %v1745_v23, %v1499_v47  ;;  %v1502_v54 = vadd.f32 %v2030_v51, %v1352_v48  ;;  %v1351_v55 = vadd.f32 %v1320_v52, %v1201_v45 }
 0x118   : > { %v1470_v57 = vpop.f32.mrf.mxu0  ;;  %v2013_v58 = vpop.f32.mrf.mxu1 }
 0x119   : > { %1522 = vst.msk [vmem:[%s2425_s21] sm:$0xff] %vm196_vm0, %v1514_v53  ;;  %v1517_v60 = vadd.f32 %v1745_v23, %v1502_v54  ;;  %v1501_v61 = vadd.f32 %v1470_v57, %v1351_v55  ;;  %v1354_v42 = vadd.f32 %v2013_v58, %v1204_v50 }
 0x11a   : > { %v2033_v62 = vpop.f32.mrf.mxu0  ;;  %v1330_v63 = vpop.f32.mrf.mxu1 }
 0x11b   : > { %1525 = vst.msk [vmem:[%s2425_s21 + $0x18] sm:$0xff] %vm196_vm0, %v1517_v60  ;;  %v1516_v1 = vadd.f32 %v1745_v23, %v1501_v61  ;;  %v1504_v3 = vadd.f32 %v2033_v62, %v1354_v42  ;;  %v1353_v5 = vadd.f32 %v1330_v63, %v1203_v56 }
 0x11c   : > { %v1480_v7 = vpop.f32.mrf.mxu0  ;;  %v2016_v10 = vpop.f32.mrf.mxu1 }
 0x11d   : > { %1524 = vst.msk [vmem:[%s2425_s21 + $0x10] sm:$0xff] %vm196_vm0, %v1516_v1  ;;  %v1519_v12 = vadd.f32 %v1745_v23, %v1504_v3  ;;  %v1503_v9 = vadd.f32 %v1480_v7, %v1353_v5  ;;  %v1356_v2 = vadd.f32 %v2016_v10, %v1206_v0 }
 0x11e   : > { %v2036_v13 = vpop.f32.mrf.mxu0  ;;  %v1340_v14 = vpop.f32.mrf.mxu1 }
 0x11f   : > { %1527 = vst.msk [vmem:[%s2425_s21 + $0x28] sm:$0xff] %vm196_vm0, %v1519_v12  ;;  %v1518_v15 = vadd.f32 %v1745_v23, %v1503_v9  ;;  %v1506_v16 = vadd.f32 %v2036_v13, %v1356_v2  ;;  %v1355_v4 = vadd.f32 %v1340_v14, %v1205_v11 }
 0x120   : > { %v1490_v18 = vpop.f32.mrf.mxu0 }
 0x121   : > { %1526 = vst.msk [vmem:[%s2425_s21 + $0x20] sm:$0xff] %vm196_vm0, %v1518_v15  ;;  %v1521_v17 = vadd.f32 %v1745_v23, %v1506_v16  ;;  %v1505_v20 = vadd.f32 %v1490_v18, %v1355_v4 }
 0x123   : > { %1529 = vst.msk [vmem:[%s2425_s21 + $0x38] sm:$0xff] %vm196_vm0, %v1521_v17  ;;  %v1520_v26 = vadd.f32 %v1745_v23, %v1505_v20 }
 0x125   : > { %1528 = vst.msk [vmem:[%s2425_s21 + $0x30] sm:$0xff] %vm196_vm0, %v1520_v26 }
 0x126 PF: > { %s13_s12 = sadd.s32 1, %s2060_s12  }
 0x127   : > { %p10_p4 = scmp.ge.s32.totalorder %s13_s12, 4  }
 0x129   :  { %12 = sbr.rel (!%p10_p4) target bundleno = 1 (0x1), region = 72 }

// kernel: tpu_custom_call.1
= control target key start
LH: loop header
LB: loop body
LE: loop exit
PB: predicated region body
PF: predicated region fallthrough
CT: control target
= control target key end

     0   :  { %vm18_vm0 = vcmask 261120   ;;  %s1180_s1 = inlined_call_operand.vmem [shape: f32[288,32], index: 1, kind: input, shape index: {}]   ;;  %s1181_s0 = inlined_call_operand.vmem [shape: f32[128,288], index: 0, kind: input, shape index: {}]   ;;  %s1182_s2 = inlined_call_operand.vmem [shape: f32[1,32], index: 2, kind: input, shape index: {}]   ;;  %s1183_s3 = inlined_call_operand.vmem [shape: f32[128,32], index: 3, kind: output, shape index: {}]  }
   0x1   :  { %v130_v0 = vld [vmem:[%s1180_s1 + $0xf8] sm:$0xff]  ;;  %v129_v2 = vld [vmem:[%s1180_s1 + $0xf0] sm:$0xff]  ;;  %v128_v4 = vld [vmem:[%s1180_s1 + $0xe8] sm:$0xff] }
   0x2   :  { %v114_v1 = vld [vmem:[%s1180_s1 + $0x78] sm:$0xff]  ;;  %585 = vmatprep.subr.mxu0 %v130_v0  ;;  %717 = vmatprep.subr.mxu1 %v130_v0  ;;  %v113_v3 = vld [vmem:[%s1180_s1 + $0x70] sm:$0xff]  ;;  %v112_v5 = vld [vmem:[%s1180_s1 + $0x68] sm:$0xff] }
   0x3   :  { %586 = vmatpush3.msra.mxu0 %v114_v1  ;;  %733 = vmatpush3.msra.mxu1 %v114_v1  ;;  %v127_v6 = vld [vmem:[%s1180_s1 + $0xe0] sm:$0xff]  ;;  %v126_v8 = vld [vmem:[%s1180_s1 + $0xd8] sm:$0xff]  ;;  %v125_v10 = vld [vmem:[%s1180_s1 + $0xd0] sm:$0xff] }
   0x4   :  { %587 = vmatprep.subr.mxu0 %v129_v2  ;;  %718 = vmatprep.subr.mxu1 %v129_v2  ;;  %v111_v7 = vld [vmem:[%s1180_s1 + $0x60] sm:$0xff]  ;;  %v110_v9 = vld [vmem:[%s1180_s1 + $0x58] sm:$0xff]  ;;  %v109_v11 = vld [vmem:[%s1180_s1 + $0x50] sm:$0xff] }
   0x5   :  { %588 = vmatpush3.msra.mxu0 %v113_v3  ;;  %734 = vmatpush3.msra.mxu1 %v113_v3  ;;  %v124_v12 = vld [vmem:[%s1180_s1 + $0xc8] sm:$0xff]  ;;  %v123_v14 = vld [vmem:[%s1180_s1 + $0xc0] sm:$0xff]  ;;  %v122_v16 = vld [vmem:[%s1180_s1 + $0xb8] sm:$0xff] }
   0x6   :  { %589 = vmatprep.subr.mxu0 %v128_v4  ;;  %719 = vmatprep.subr.mxu1 %v128_v4  ;;  %v108_v13 = vld [vmem:[%s1180_s1 + $0x48] sm:$0xff]  ;;  %v107_v15 = vld [vmem:[%s1180_s1 + $0x40] sm:$0xff]  ;;  %v106_v17 = vld [vmem:[%s1180_s1 + $0x38] sm:$0xff] }
   0x7   :  { %590 = vmatpush3.msra.mxu0 %v112_v5  ;;  %735 = vmatpush3.msra.mxu1 %v112_v5  ;;  %v121_v18 = vld [vmem:[%s1180_s1 + $0xb0] sm:$0xff]  ;;  %v120_v20 = vld [vmem:[%s1180_s1 + $0xa8] sm:$0xff]  ;;  %v119_v22 = vld [vmem:[%s1180_s1 + $0xa0] sm:$0xff] }
   0x8   :  { %591 = vmatprep.subr.mxu0 %v127_v6  ;;  %720 = vmatprep.subr.mxu1 %v127_v6  ;;  %v105_v19 = vld [vmem:[%s1180_s1 + $0x30] sm:$0xff]  ;;  %v104_v21 = vld [vmem:[%s1180_s1 + $0x28] sm:$0xff]  ;;  %v103_v23 = vld [vmem:[%s1180_s1 + $0x20] sm:$0xff] }
   0x9   :  { %592 = vmatpush3.msra.mxu0 %v111_v7  ;;  %736 = vmatpush3.msra.mxu1 %v111_v7  ;;  %v118_v24 = vld [vmem:[%s1180_s1 + $0x98] sm:$0xff]  ;;  %v117_v26 = vld [vmem:[%s1180_s1 + $0x90] sm:$0xff]  ;;  %v116_v28 = vld [vmem:[%s1180_s1 + $0x88] sm:$0xff] }
   0xa   :  { %593 = vmatprep.subr.mxu0 %v126_v8  ;;  %721 = vmatprep.subr.mxu1 %v126_v8  ;;  %v102_v25 = vld [vmem:[%s1180_s1 + $0x18] sm:$0xff]  ;;  %v101_v27 = vld [vmem:[%s1180_s1 + $0x10] sm:$0xff]  ;;  %v100_v29 = vld [vmem:[%s1180_s1 + $0x8] sm:$0xff] }
   0xb   :  { %594 = vmatpush3.msra.mxu0 %v110_v9  ;;  %737 = vmatpush3.msra.mxu1 %v110_v9  ;;  %v115_v30 = vld [vmem:[%s1180_s1 + $0x80] sm:$0xff]  ;;  %v52_v32 = vld [vmem:[%s1181_s0 + $0x8] sm:$0xff]  ;;  %v134_v36 = vld [vmem:[%s1180_s1 + $0x118] sm:$0xff] }
   0xc   :  { %595 = vmatprep.subr.mxu0 %v125_v10  ;;  %722 = vmatprep.subr.mxu1 %v125_v10  ;;  %v99_v31 = vld [vmem:[%s1180_s1] sm:$0xff]  ;;  %v88_v33 = vld [vmem:[%s1181_s0 + $0x128] sm:$0xff]  ;;  %v133_v39 = vld [vmem:[%s1180_s1 + $0x110] sm:$0xff] }
   0xd   :  { %596 = vmatpush3.msra.mxu0 %v109_v11  ;;  %738 = vmatpush3.msra.mxu1 %v109_v11  ;;  %v51_v34 = vld [vmem:[%s1181_s0] sm:$0xff]  ;;  %v54_v40 = vld [vmem:[%s1181_s0 + $0x18] sm:$0xff]  ;;  %v132_v44 = vld [vmem:[%s1180_s1 + $0x108] sm:$0xff] }
   0xe   :  { %597 = vmatprep.subr.mxu0 %v124_v12  ;;  %723 = vmatprep.subr.mxu1 %v124_v12  ;;  %v87_v35 = vld [vmem:[%s1181_s0 + $0x120] sm:$0xff]  ;;  %v90_v41 = vld [vmem:[%s1181_s0 + $0x138] sm:$0xff]  ;;  %v57_v45 = vld [vmem:[%s1181_s0 + $0x30] sm:$0xff] }
   0xf   :  { %598 = vmatpush3.msra.mxu0 %v108_v13  ;;  %739 = vmatpush3.msra.mxu1 %v108_v13  ;;  %v55_v37 = vld [vmem:[%s1181_s0 + $0x20] sm:$0xff]  ;;  %v58_v42 = vld [vmem:[%s1181_s0 + $0x38] sm:$0xff]  ;;  %v93_v46 = vld [vmem:[%s1181_s0 + $0x150] sm:$0xff] }
  0x10   :  { %599 = vmatprep.subr.mxu0 %v123_v14  ;;  %724 = vmatprep.subr.mxu1 %v123_v14  ;;  %v91_v38 = vld [vmem:[%s1181_s0 + $0x140] sm:$0xff]  ;;  %v94_v43 = vld [vmem:[%s1181_s0 + $0x158] sm:$0xff]  ;;  %v61_v47 = vld [vmem:[%s1181_s0 + $0x50] sm:$0xff] }
  0x11   :  { %600 = vmatpush3.msra.mxu0 %v107_v15  ;;  %740 = vmatpush3.msra.mxu1 %v107_v15  ;;  %v97_v48 = vld [vmem:[%s1181_s0 + $0x170] sm:$0xff]  ;;  %v131_v49 = vld [vmem:[%s1180_s1 + $0x100] sm:$0xff]  ;;  %v60_v50 = vld [vmem:[%s1181_s0 + $0x48] sm:$0xff] }
  0x12   :  { %601 = vmatprep.subr.mxu0 %v122_v16  ;;  %725 = vmatprep.subr.mxu1 %v122_v16  ;;  %v96_v51 = vld [vmem:[%s1181_s0 + $0x168] sm:$0xff]  ;;  %v53_v53 = vld [vmem:[%s1181_s0 + $0x10] sm:$0xff]  ;;  %v63_v54 = vld [vmem:[%s1181_s0 + $0x60] sm:$0xff] }
  0x13   :  { %602 = vmatpush3.msra.mxu0 %v106_v17  ;;  %741 = vmatpush3.msra.mxu1 %v106_v17  ;;  %v64_v52 = vld [vmem:[%s1181_s0 + $0x68] sm:$0xff]  ;;  %v67_v56 = vld [vmem:[%s1181_s0 + $0x80] sm:$0xff]  ;;  %v66_v58 = vld [vmem:[%s1181_s0 + $0x78] sm:$0xff] }
  0x14   :  { %603 = vmatprep.subr.mxu0 %v121_v18  ;;  %726 = vmatprep.subr.mxu1 %v121_v18  ;;  %v56_v55 = vld [vmem:[%s1181_s0 + $0x28] sm:$0xff]  ;;  %v59_v57 = vld [vmem:[%s1181_s0 + $0x40] sm:$0xff]  ;;  %v62_v59 = vld [vmem:[%s1181_s0 + $0x58] sm:$0xff] }
  0x15   :  { %604 = vmatpush3.msra.mxu0 %v105_v19  ;;  %742 = vmatpush3.msra.mxu1 %v105_v19  ;;  %v70_v60 = vld [vmem:[%s1181_s0 + $0x98] sm:$0xff]  ;;  %v65_v61 = vld [vmem:[%s1181_s0 + $0x70] sm:$0xff]  ;;  %v68_v63 = vld [vmem:[%s1181_s0 + $0x88] sm:$0xff] }
  0x16   :  { %605 = vmatprep.subr.mxu0 %v120_v20  ;;  %727 = vmatprep.subr.mxu1 %v120_v20  ;;  %v69_v62 = vld [vmem:[%s1181_s0 + $0x90] sm:$0xff]  ;;  %v71_v1 = vld [vmem:[%s1181_s0 + $0xa0] sm:$0xff]  ;;  %v72_v2 = vld [vmem:[%s1181_s0 + $0xa8] sm:$0xff]  ;;  %v750_v20 = vmov 0.0  }
  0x17   :  { %606 = vmatpush3.msra.mxu0 %v104_v21  ;;  %743 = vmatpush3.msra.mxu1 %v104_v21  ;;  %v73_v0 = vld [vmem:[%s1181_s0 + $0xb0] sm:$0xff]  ;;  %v74_v3 = vld [vmem:[%s1181_s0 + $0xb8] sm:$0xff]  ;;  %v76_v4 = vld [vmem:[%s1181_s0 + $0xc8] sm:$0xff]  ;;  %20 = vst.msk [vmem:[#allocation2 + $0x8] sm:$0xff] %vm18_vm0, %v750_v20 }
  0x18   :  { %607 = vmatprep.subr.mxu0 %v119_v22  ;;  %728 = vmatprep.subr.mxu1 %v119_v22  ;;  %v77_v5 = vld [vmem:[%s1181_s0 + $0xd0] sm:$0xff]  ;;  %v75_v6 = vld [vmem:[%s1181_s0 + $0xc0] sm:$0xff]  ;;  %v80_v7 = vld [vmem:[%s1181_s0 + $0xe8] sm:$0xff]  ;;  %19 = vst.msk [vmem:[#allocation2] sm:$0xff] %vm18_vm0, %v750_v20 }
  0x19   :  { %608 = vmatpush3.msra.mxu0 %v103_v23  ;;  %744 = vmatpush3.msra.mxu1 %v103_v23  ;;  %v79_v8 = vld [vmem:[%s1181_s0 + $0xe0] sm:$0xff]  ;;  %v78_v10 = vld [vmem:[%s1181_s0 + $0xd8] sm:$0xff]  ;;  %v89_v13 = vld [vmem:[%s1181_s0 + $0x130] sm:$0xff]  ;;  %21 = vst.msk [vmem:[#allocation2 + $0x10] sm:$0xff] %vm18_vm0, %v750_v20 }
  0x1a   :  { %609 = vmatprep.subr.mxu0 %v118_v24  ;;  %729 = vmatprep.subr.mxu1 %v118_v24  ;;  %v83_v9 = vld [vmem:[%s1181_s0 + $0x100] sm:$0xff]  ;;  %v86_v11 = vld [vmem:[%s1181_s0 + $0x118] sm:$0xff]  ;;  %v81_v14 = vld [vmem:[%s1181_s0 + $0xf0] sm:$0xff]  ;;  %22 = vst.msk [vmem:[#allocation2 + $0x18] sm:$0xff] %vm18_vm0, %v750_v20 }
  0x1b   :  { %610 = vmatpush3.msra.mxu0 %v102_v25  ;;  %745 = vmatpush3.msra.mxu1 %v102_v25  ;;  %v82_v12 = vld [vmem:[%s1181_s0 + $0xf8] sm:$0xff]  ;;  %v92_v15 = vld [vmem:[%s1181_s0 + $0x148] sm:$0xff]  ;;  %v85_v16 = vld [vmem:[%s1181_s0 + $0x110] sm:$0xff]  ;;  %23 = vst.msk [vmem:[#allocation2 + $0x20] sm:$0xff] %vm18_vm0, %v750_v20 }
  0x1c   :  { %611 = vmatprep.subr.mxu0 %v117_v26  ;;  %730 = vmatprep.subr.mxu1 %v117_v26  ;;  %v95_v17 = vld [vmem:[%s1181_s0 + $0x160] sm:$0xff]  ;;  %v84_v18 = vld [vmem:[%s1181_s0 + $0x108] sm:$0xff]  ;;  %v98_v19 = vld [vmem:[%s1181_s0 + $0x178] sm:$0xff]  ;;  %24 = vst.msk [vmem:[#allocation2 + $0x28] sm:$0xff] %vm18_vm0, %v750_v20 }
  0x1d   :  { %612 = vmatpush3.msra.mxu0 %v101_v27  ;;  %746 = vmatpush3.msra.mxu1 %v101_v27  ;;  %25 = vst.msk [vmem:[#allocation2 + $0x30] sm:$0xff] %vm18_vm0, %v750_v20  ;;  %26 = vst.msk [vmem:[#allocation2 + $0x38] sm:$0xff] %vm18_vm0, %v750_v20 }
  0x1e   :  { %613 = vmatprep.subr.mxu0 %v116_v28  ;;  %731 = vmatprep.subr.mxu1 %v116_v28  ;;  %27 = vst.msk [vmem:[#allocation2 + $0x40] sm:$0xff] %vm18_vm0, %v750_v20  ;;  %28 = vst.msk [vmem:[#allocation2 + $0x48] sm:$0xff] %vm18_vm0, %v750_v20 }
  0x1f   :  { %614 = vmatpush3.msra.mxu0 %v100_v29  ;;  %747 = vmatpush3.msra.mxu1 %v100_v29  ;;  %29 = vst.msk [vmem:[#allocation2 + $0x50] sm:$0xff] %vm18_vm0, %v750_v20  ;;  %30 = vst.msk [vmem:[#allocation2 + $0x58] sm:$0xff] %vm18_vm0, %v750_v20 }
  0x20   :  { %615 = vmatprep.subr.mxu0 %v115_v30  ;;  %732 = vmatprep.subr.mxu1 %v115_v30  ;;  %31 = vst.msk [vmem:[#allocation2 + $0x60] sm:$0xff] %vm18_vm0, %v750_v20  ;;  %32 = vst.msk [vmem:[#allocation2 + $0x68] sm:$0xff] %vm18_vm0, %v750_v20 }
  0x21   :  { %616 = vmatpush3.msra.mxu0 %v99_v31  ;;  %748 = vmatpush3.msra.mxu1 %v99_v31  ;;  %33 = vst.msk [vmem:[#allocation2 + $0x70] sm:$0xff] %vm18_vm0, %v750_v20  ;;  %34 = vst.msk [vmem:[#allocation2 + $0x78] sm:$0xff] %vm18_vm0, %v750_v20 }
  0x22   :  { %248 = vmatprep.mubr.f32.mxu0 %v52_v32  ;;  %308 = vmatprep.mubr.f32.mxu1 %v88_v33 }
  0x23   :  { %249 = vmatmul.mubr.f32.vlgmr.msra.gmra.mxu0 %v51_v34  ;;  %309 = vmatmul.mubr.f32.vlgmr.msra.gmra.mxu1 %v87_v35 }
  0x24   :  { %685 = vmatprep.subr.mxu1 %v134_v36  ;;  %253 = vmatprep.mubr.f32.mxu0 %v55_v37 }
  0x25   :  { %686 = vmatpush3.msra.mxu1 %v134_v36  ;;  %313 = vmatprep.mubr.f32.mxu1 %v91_v38 }
  0x26   :  { %687 = vmatprep.subr.mxu1 %v133_v39 }
  0x27   :  { %254 = vmatmul.mubr.f32.gmra.mxu0 %v54_v40  ;;  %314 = vmatmul.mubr.f32.gmra.mxu1 %v90_v41 }
  0x28   :  { %688 = vmatpush3.msra.mxu1 %v133_v39  ;;  %258 = vmatprep.mubr.f32.mxu0 %v58_v42  ;;  %v36_v39 = vld [vmem:[#allocation2 + $0x8] sm:$0xff] }
  0x29   :  { %318 = vmatprep.mubr.f32.mxu1 %v94_v43  ;;  %689 = vmatprep.subr.mxu1 %v132_v44 }
  0x2a   :  { %690 = vmatpush3.msra.mxu1 %v132_v44  ;;  %v35_v44 = vld [vmem:[#allocation2] sm:$0xff] }
  0x2b   :  { %259 = vmatmul.mubr.f32.gmra.mxu0 %v57_v45  ;;  %319 = vmatmul.mubr.f32.gmra.mxu1 %v93_v46 }
  0x2c   :  { %263 = vmatprep.mubr.f32.mxu0 %v61_v47  ;;  %323 = vmatprep.mubr.f32.mxu1 %v97_v48 }
  0x2d   :  { %691 = vmatprep.subr.mxu1 %v131_v49 }
  0x2e   :  { %692 = vmatpush3.msra.mxu1 %v131_v49 }
  0x2f   :  { %264 = vmatmul.mubr.f32.gmra.mxu0 %v60_v50  ;;  %324 = vmatmul.mubr.f32.gmra.mxu1 %v96_v51  ;;  %v38_v50 = vld [vmem:[#allocation2 + $0x18] sm:$0xff] }
  0x30   :  { %268 = vmatprep.mubr.f32.mxu0 %v64_v52  ;;  %693 = vmatprep.mubr.msk.f32.mxu1 %vm18_vm0, %v53_v53 }
  0x33   :  { %269 = vmatmul.mubr.f32.gmra.mxu0 %v63_v54  ;;  %694 = vmatmul.mubr.msk.f32.vlgmr.msra.gmra.mxu1 %vm18_vm0, %v56_v55 }
  0x34   :  { %273 = vmatprep.mubr.f32.mxu0 %v67_v56  ;;  %696 = vmatprep.mubr.msk.f32.mxu1 %vm18_vm0, %v59_v57  ;;  %v37_v56 = vld [vmem:[#allocation2 + $0x10] sm:$0xff] }
  0x37   :  { %274 = vmatmul.mubr.f32.gmra.mxu0 %v66_v58  ;;  %697 = vmatmul.mubr.msk.f32.gmra.mxu1 %vm18_vm0, %v62_v59 }
  0x38   :  { %278 = vmatprep.mubr.f32.mxu0 %v70_v60  ;;  %699 = vmatprep.mubr.msk.f32.mxu1 %vm18_vm0, %v65_v61 }
  0x3b   :  { %279 = vmatmul.mubr.f32.gmra.mxu0 %v69_v62  ;;  %700 = vmatmul.mubr.msk.f32.gmra.mxu1 %vm18_vm0, %v68_v63  ;;  %v40_v62 = vld [vmem:[#allocation2 + $0x28] sm:$0xff] }
  0x3c   :  { %283 = vmatprep.mubr.f32.mxu0 %v73_v0  ;;  %702 = vmatprep.mubr.msk.f32.mxu1 %vm18_vm0, %v71_v1 }
  0x3f   :  { %284 = vmatmul.mubr.f32.gmra.mxu0 %v72_v2  ;;  %703 = vmatmul.mubr.msk.f32.gmra.mxu1 %vm18_vm0, %v74_v3  ;;  %v1077_v3 = vld [vmem:[%s1182_s2] ss:$0 sm:$0xff] }
  0x40   :  { %288 = vmatprep.mubr.f32.mxu0 %v76_v4  ;;  %705 = vmatprep.mubr.msk.f32.mxu1 %vm18_vm0, %v77_v5  ;;  %v39_v5 = vld [vmem:[#allocation2 + $0x20] sm:$0xff] }
  0x43   :  { %289 = vmatmul.mubr.f32.gmra.mxu0 %v75_v6  ;;  %706 = vmatmul.mubr.msk.f32.gmra.mxu1 %vm18_vm0, %v80_v7 }
  0x44   :  { %293 = vmatprep.mubr.f32.mxu0 %v79_v8  ;;  %708 = vmatprep.mubr.msk.f32.mxu1 %vm18_vm0, %v83_v9 }
  0x47   :  { %294 = vmatmul.mubr.f32.gmra.mxu0 %v78_v10  ;;  %709 = vmatmul.mubr.msk.f32.gmra.mxu1 %vm18_vm0, %v86_v11 }
  0x48   :  { %298 = vmatprep.mubr.f32.mxu0 %v82_v12  ;;  %711 = vmatprep.mubr.msk.f32.mxu1 %vm18_vm0, %v89_v13 }
  0x4b   :  { %299 = vmatmul.mubr.f32.gmra.mxu0 %v81_v14  ;;  %712 = vmatmul.mubr.msk.f32.gmra.mxu1 %vm18_vm0, %v92_v15 }
  0x4c   :  { %303 = vmatprep.mubr.f32.mxu0 %v85_v16  ;;  %714 = vmatprep.mubr.msk.f32.mxu1 %vm18_vm0, %v95_v17  ;;  %v41_v17 = vld [vmem:[#allocation2 + $0x30] sm:$0xff] }
  0x4f   :  { %304 = vmatmul.mubr.f32.gmra.mxu0 %v84_v18  ;;  %715 = vmatmul.mubr.msk.f32.gmra.mxu1 %vm18_vm0, %v98_v19 }
  0xe3   :  { %v617_v21 = vpop.f32.mrf.mxu0  ;;  %v1055_v22 = vpop.f32.mrf.mxu1 }
  0xe5   :  { %v618_v23 = vpop.f32.mrf.mxu0  ;;  %v1057_v24 = vpop.f32.mrf.mxu1 }
  0xe6   :  { %v619_v41 = vadd.f32 %v618_v23, %v617_v21 }
  0xe7   :  { %v620_v25 = vpop.f32.mrf.mxu0  ;;  %v1059_v26 = vpop.f32.mrf.mxu1 }
  0xe9   :  { %v621_v27 = vpop.f32.mrf.mxu0  ;;  %v1061_v28 = vpop.f32.mrf.mxu1 }
  0xea   :  { %v622_v37 = vadd.f32 %v621_v27, %v620_v25  ;;  %v42_v25 = vld [vmem:[#allocation2 + $0x38] sm:$0xff] }
  0xeb   :  { %v623_v29 = vpop.f32.mrf.mxu0  ;;  %v1063_v30 = vpop.f32.mrf.mxu1 }
  0xed   :  { %v624_v31 = vpop.f32.mrf.mxu0  ;;  %v1065_v32 = vpop.f32.mrf.mxu1 }
  0xee   :  { %v625_v52 = vadd.f32 %v624_v31, %v623_v29 }
  0xef   :  { %v626_v33 = vpop.f32.mrf.mxu0  ;;  %v1067_v34 = vpop.f32.mrf.mxu1 }
  0xf1   :  { %v627_v35 = vpop.f32.mrf.mxu0  ;;  %v1069_v36 = vpop.f32.mrf.mxu1 }
  0xf2   :  { %v628_v46 = vadd.f32 %v627_v35, %v626_v33 }
  0xf3   :  { %v629_v38 = vpop.f32.mrf.mxu0  ;;  %v695_v40 = vpop.f32.mrf.mxu1 }
  0xf4   :  { %v401_v42 = vadd.f32 %v695_v40, %v622_v37 }
  0xf5   :  { %v630_v43 = vpop.f32.mrf.mxu0  ;;  %v395_v45 = vpop.f32.mrf.mxu1 }
  0xf6   :  { %v475_v47 = vadd.f32 %v401_v42, %v36_v39  ;;  %v396_v48 = vadd.f32 %v619_v41, %v395_v45  ;;  %v631_v0 = vadd.f32 %v630_v43, %v629_v38 }
  0xf7   :  { %v632_v49 = vpop.f32.mrf.mxu0  ;;  %v698_v51 = vpop.f32.mrf.mxu1 }
  0xf8   :  { %491 = vst.msk [vmem:[#allocation2 + $0x8] sm:$0xff] %vm18_vm0, %v475_v47  ;;  %v474_v53 = vadd.f32 %v396_v48, %v35_v44  ;;  %v411_v54 = vadd.f32 %v698_v51, %v628_v46  ;;  %v43_v44 = vld [vmem:[#allocation2 + $0x40] sm:$0xff] }
  0xf9   :  { %v633_v55 = vpop.f32.mrf.mxu0  ;;  %v405_v57 = vpop.f32.mrf.mxu1 }
  0xfa   :  { %490 = vst.msk [vmem:[#allocation2] sm:$0xff] %vm18_vm0, %v474_v53  ;;  %v477_v58 = vadd.f32 %v411_v54, %v38_v50  ;;  %v634_v59 = vadd.f32 %v633_v55, %v632_v49  ;;  %v406_v60 = vadd.f32 %v625_v52, %v405_v57  ;;  %v658_v52 = vadd.f32 %v1061_v28, %v1059_v26 }
  0xfb   :  { %v635_v61 = vpop.f32.mrf.mxu0  ;;  %v701_v63 = vpop.f32.mrf.mxu1 }
  0xfc   :  { %493 = vst.msk [vmem:[#allocation2 + $0x18] sm:$0xff] %vm18_vm0, %v477_v58  ;;  %v476_v1 = vadd.f32 %v406_v60, %v37_v56  ;;  %v421_v2 = vadd.f32 %v701_v63, %v634_v59  ;;  %v44_v56 = vld [vmem:[#allocation2 + $0x48] sm:$0xff]  ;;  %v655_v60 = vadd.f32 %v1057_v24, %v1055_v22  ;;  %v661_v22 = vadd.f32 %v1065_v32, %v1063_v30 }
  0xfd   :  { %v636_v4 = vpop.f32.mrf.mxu0  ;;  %v415_v6 = vpop.f32.mrf.mxu1  ;;  %v48_v58 = vld [vmem:[#allocation2 + $0x68] sm:$0xff] }
  0xfe   :  { %492 = vst.msk [vmem:[#allocation2 + $0x10] sm:$0xff] %vm18_vm0, %v476_v1  ;;  %v479_v7 = vadd.f32 %v421_v2, %v40_v62  ;;  %v416_v8 = vadd.f32 %v631_v0, %v415_v6  ;;  %v637_v13 = vadd.f32 %v636_v4, %v635_v61  ;;  %v664_v61 = vadd.f32 %v1069_v36, %v1067_v34  ;;  %v47_v6 = vld [vmem:[#allocation2 + $0x60] sm:$0xff] }
  0xff   :  { %v510_v9 = vld [vmem:[#allocation2 + $0x8] sm:$0xff]  ;;  %v638_v10 = vpop.f32.mrf.mxu0  ;;  %v704_v11 = vpop.f32.mrf.mxu1 }
 0x100   :  { %v533_v12 = vadd.f32 %v1077_v3, %v510_v9  ;;  %495 = vst.msk [vmem:[#allocation2 + $0x28] sm:$0xff] %vm18_vm0, %v479_v7  ;;  %v478_v14 = vadd.f32 %v416_v8, %v39_v5  ;;  %v45_v8 = vld [vmem:[#allocation2 + $0x50] sm:$0xff] }
 0x101   :  { %v509_v15 = vld [vmem:[#allocation2] sm:$0xff]  ;;  %v639_v16 = vpop.f32.mrf.mxu0  ;;  %v425_v18 = vpop.f32.mrf.mxu1 }
 0x102   :  { %549 = vst.msk [vmem:[%s1183_s3 + $0x8] sm:$0xff] %vm18_vm0, %v533_v12  ;;  %v532_v19 = vadd.f32 %v1077_v3, %v509_v15  ;;  %494 = vst.msk [vmem:[#allocation2 + $0x20] sm:$0xff] %vm18_vm0, %v478_v14  ;;  %v640_v20 = vadd.f32 %v639_v16, %v638_v10  ;;  %v426_v21 = vadd.f32 %v637_v13, %v425_v18  ;;  %v49_v15 = vld [vmem:[#allocation2 + $0x70] sm:$0xff] }
 0x103   :  { %v512_v23 = vld [vmem:[#allocation2 + $0x18] sm:$0xff]  ;;  %v641_v27 = vpop.f32.mrf.mxu0  ;;  %v707_v29 = vpop.f32.mrf.mxu1 }
 0x104   :  { %548 = vst.msk [vmem:[%s1183_s3] sm:$0xff] %vm18_vm0, %v532_v19  ;;  %v535_v31 = vadd.f32 %v1077_v3, %v512_v23  ;;  %v431_v33 = vadd.f32 %v704_v11, %v640_v20  ;;  %v480_v35 = vadd.f32 %v426_v21, %v41_v17  ;;  %v50_v11 = vld [vmem:[#allocation2 + $0x78] sm:$0xff] }
 0x105   :  { %v511_v37 = vld [vmem:[#allocation2 + $0x10] sm:$0xff]  ;;  %v642_v38 = vpop.f32.mrf.mxu0  ;;  %v435_v39 = vpop.f32.mrf.mxu1  ;;  %v46_v20 = vld [vmem:[#allocation2 + $0x58] sm:$0xff] }
 0x106   :  { %551 = vst.msk [vmem:[%s1183_s3 + $0x18] sm:$0xff] %vm18_vm0, %v535_v31  ;;  %v534_v40 = vadd.f32 %v1077_v3, %v511_v37  ;;  %v481_v41 = vadd.f32 %v431_v33, %v42_v25  ;;  %496 = vst.msk [vmem:[#allocation2 + $0x30] sm:$0xff] %vm18_vm0, %v480_v35  ;;  %v643_v42 = vadd.f32 %v642_v38, %v641_v27 }
 0x107   :  { %v514_v43 = vld [vmem:[#allocation2 + $0x28] sm:$0xff]  ;;  %v644_v45 = vpop.f32.mrf.mxu0  ;;  %v710_v46 = vpop.f32.mrf.mxu1 }
 0x108   :  { %550 = vst.msk [vmem:[%s1183_s3 + $0x10] sm:$0xff] %vm18_vm0, %v534_v40  ;;  %v537_v47 = vadd.f32 %v1077_v3, %v514_v43  ;;  %497 = vst.msk [vmem:[#allocation2 + $0x38] sm:$0xff] %vm18_vm0, %v481_v41  ;;  %v436_v48 = vadd.f32 %v643_v42, %v435_v39 }
 0x109   :  { %v513_v49 = vld [vmem:[#allocation2 + $0x20] sm:$0xff]  ;;  %v645_v50 = vpop.f32.mrf.mxu0  ;;  %v445_v51 = vpop.f32.mrf.mxu1 }
 0x10a   :  { %553 = vst.msk [vmem:[%s1183_s3 + $0x28] sm:$0xff] %vm18_vm0, %v537_v47  ;;  %v536_v53 = vadd.f32 %v1077_v3, %v513_v49  ;;  %v482_v54 = vadd.f32 %v436_v48, %v43_v44  ;;  %v646_v55 = vadd.f32 %v645_v50, %v644_v45 }
 0x10b   :  { %v647_v57 = vpop.f32.mrf.mxu0  ;;  %v713_v59 = vpop.f32.mrf.mxu1 }
 0x10c   :  { %552 = vst.msk [vmem:[%s1183_s3 + $0x20] sm:$0xff] %vm18_vm0, %v536_v53  ;;  %498 = vst.msk [vmem:[#allocation2 + $0x40] sm:$0xff] %vm18_vm0, %v482_v54  ;;  %v441_v26 = vadd.f32 %v707_v29, %v646_v55  ;;  %v461_v28 = vadd.f32 %v713_v59, %v658_v52 }
 0x10d   :  { %v515_v62 = vld [vmem:[#allocation2 + $0x30] sm:$0xff]  ;;  %v648_v63 = vpop.f32.mrf.mxu0  ;;  %v455_v0 = vpop.f32.mrf.mxu1 }
 0x10e   :  { %v538_v1 = vadd.f32 %v1077_v3, %v515_v62  ;;  %v483_v2 = vadd.f32 %v441_v26, %v44_v56  ;;  %v487_v4 = vadd.f32 %v461_v28, %v48_v58  ;;  %v649_v5 = vadd.f32 %v648_v63, %v647_v57 }
 0x10f   :  { %v516_v7 = vld [vmem:[#allocation2 + $0x38] sm:$0xff]  ;;  %v456_v9 = vadd.f32 %v655_v60, %v455_v0  ;;  %v650_v10 = vpop.f32.mrf.mxu0  ;;  %v716_v12 = vpop.f32.mrf.mxu1 }
 0x110   :  { %v539_v24 = vadd.f32 %v1077_v3, %v516_v7  ;;  %554 = vst.msk [vmem:[%s1183_s3 + $0x30] sm:$0xff] %vm18_vm0, %v538_v1  ;;  %499 = vst.msk [vmem:[#allocation2 + $0x48] sm:$0xff] %vm18_vm0, %v483_v2  ;;  %v446_v34 = vadd.f32 %v649_v5, %v445_v51  ;;  %v471_v36 = vadd.f32 %v716_v12, %v664_v61 }
 0x111   :  { %503 = vst.msk [vmem:[#allocation2 + $0x68] sm:$0xff] %vm18_vm0, %v487_v4  ;;  %v486_v13 = vadd.f32 %v456_v9, %v47_v6  ;;  %v651_v14 = vpop.f32.mrf.mxu0  ;;  %v465_v16 = vpop.f32.mrf.mxu1 }
 0x112   :  { %555 = vst.msk [vmem:[%s1183_s3 + $0x38] sm:$0xff] %vm18_vm0, %v539_v24  ;;  %v484_v30 = vadd.f32 %v446_v34, %v45_v8  ;;  %v489_v32 = vadd.f32 %v471_v36, %v50_v11  ;;  %v652_v17 = vadd.f32 %v651_v14, %v650_v10  ;;  %v466_v18 = vadd.f32 %v661_v22, %v465_v16 }
 0x113   :  { %v517_v19 = vld [vmem:[#allocation2 + $0x40] sm:$0xff]  ;;  %502 = vst.msk [vmem:[#allocation2 + $0x60] sm:$0xff] %vm18_vm0, %v486_v13 }
 0x114   :  { %v540_v21 = vadd.f32 %v1077_v3, %v517_v19  ;;  %500 = vst.msk [vmem:[#allocation2 + $0x50] sm:$0xff] %vm18_vm0, %v484_v30  ;;  %505 = vst.msk [vmem:[#allocation2 + $0x78] sm:$0xff] %vm18_vm0, %v489_v32  ;;  %v451_v23 = vadd.f32 %v710_v46, %v652_v17  ;;  %v488_v25 = vadd.f32 %v466_v18, %v49_v15 }
 0x116   :  { %556 = vst.msk [vmem:[%s1183_s3 + $0x40] sm:$0xff] %vm18_vm0, %v540_v21  ;;  %v485_v27 = vadd.f32 %v451_v23, %v46_v20  ;;  %504 = vst.msk [vmem:[#allocation2 + $0x70] sm:$0xff] %vm18_vm0, %v488_v25 }
 0x117   :  { %v518_v29 = vld [vmem:[#allocation2 + $0x48] sm:$0xff] }
 0x118   :  { %v522_v31 = vld [vmem:[#allocation2 + $0x68] sm:$0xff]  ;;  %v541_v33 = vadd.f32 %v1077_v3, %v518_v29  ;;  %501 = vst.msk [vmem:[#allocation2 + $0x58] sm:$0xff] %vm18_vm0, %v485_v27 }
 0x119   :  { %v545_v35 = vadd.f32 %v1077_v3, %v522_v31 }
 0x11a   :  { %557 = vst.msk [vmem:[%s1183_s3 + $0x48] sm:$0xff] %vm18_vm0, %v541_v33  ;;  %v521_v37 = vld [vmem:[#allocation2 + $0x60] sm:$0xff] }
 0x11b   :  { %561 = vst.msk [vmem:[%s1183_s3 + $0x68] sm:$0xff] %vm18_vm0, %v545_v35  ;;  %v519_v38 = vld [vmem:[#allocation2 + $0x50] sm:$0xff]  ;;  %v544_v39 = vadd.f32 %v1077_v3, %v521_v37  ;;  %v524_v40 = vld [vmem:[#allocation2 + $0x78] sm:$0xff] }
 0x11c   :  { %v542_v41 = vadd.f32 %v1077_v3, %v519_v38  ;;  %v547_v42 = vadd.f32 %v1077_v3, %v524_v40 }
 0x11d   :  { %560 = vst.msk [vmem:[%s1183_s3 + $0x60] sm:$0xff] %vm18_vm0, %v544_v39  ;;  %v523_v43 = vld [vmem:[#allocation2 + $0x70] sm:$0xff] }
 0x11e   :  { %558 = vst.msk [vmem:[%s1183_s3 + $0x50] sm:$0xff] %vm18_vm0, %v542_v41  ;;  %563 = vst.msk [vmem:[%s1183_s3 + $0x78] sm:$0xff] %vm18_vm0, %v547_v42  ;;  %v546_v44 = vadd.f32 %v1077_v3, %v523_v43 }
 0x11f   :  { %v520_v45 = vld [vmem:[#allocation2 + $0x58] sm:$0xff] }
 0x120   :  { %v543_v46 = vadd.f32 %v1077_v3, %v520_v45  ;;  %562 = vst.msk [vmem:[%s1183_s3 + $0x70] sm:$0xff] %vm18_vm0, %v546_v44 }
 0x122   :  { %559 = vst.msk [vmem:[%s1183_s3 + $0x58] sm:$0xff] %vm18_vm0, %v543_v46 }

</bundles_post_ra>
